<compile_context>
chip_gen: v6e
topology: v6e:2x2x1
jax: 0.10.0
libtpu: 0.0.40
codegen_flags: <defaults>
</compile_context>

<pallas_src>
import functools

import jax
import jax.numpy as jnp
from jax import lax
from jax.experimental import pallas as pl
from jax.experimental.pallas import tpu as pltpu


# ---------------------------------------------------------------------------
# Kernel
# ---------------------------------------------------------------------------
def _sdpa_kernel(q_ref, k_ref, v_ref, o_ref, a_ref, *, inv_temperature, mxu_dtype):
    """One (batch-tile, q-tile) grid step.

    Blocks: q (bt, tq, Dk), k (bt, Lk, Dk), v (bt, Lk, Dv).
    o_ref / a_ref may use the lane-dense flattened layout (bt, tq*Dv) / (bt, tq*Lk);
    computed tiles are reshaped to whatever the out refs are (no-op if un-flattened).
    """
    q = q_ref[...]
    k = k_ref[...]
    v = v_ref[...]

    # Fold 1/temperature into q: scales tq*Dk elements instead of tq*Lk scores.
    q = q * jnp.asarray(inv_temperature, q.dtype)

    if mxu_dtype is not None:  # optional reduced-precision MXU operands (f32 acc)
        q = q.astype(mxu_dtype)
        k = k.astype(mxu_dtype)

    # Scores: contract the last dims of q and k directly (no explicit k.T, no XLU
    # transpose / extra VMEM copy).
    s = lax.dot_general(
        q, k,
        dimension_numbers=(((2,), (2,)), ((0,), (0,))),
        preferred_element_type=jnp.float32,
    )  # (bt, tq, Lk) f32

    # Numerically-stable softmax over len_k (== Softmax(dim=2) in the module).
    # Exact reciprocal: the approx EUP reciprocal caused the previous correctness
    # failure and made attn rows not sum to 1; divide only the (bt, tq, 1) denom.
    m = jnp.max(s, axis=-1, keepdims=True)
    e = jnp.exp(s - m)  # TODO(synk): bf16 exp on bf16-EUP gens (v6e/v7x) if tolerance allows
    inv = 1.0 / jnp.sum(e, axis=-1, keepdims=True)
    attn = e * inv  # (bt, tq, Lk) f32

    a_ref[...] = attn.astype(a_ref.dtype).reshape(a_ref.shape)

    p = attn.astype(v.dtype if mxu_dtype is None else mxu_dtype)
    vv = v if mxu_dtype is None else v.astype(mxu_dtype)
    o = lax.dot_general(
        p, vv,
        dimension_numbers=(((2,), (1,)), ((0,), (0,))),
        preferred_element_type=jnp.float32,
    )  # (bt, tq, Dv) f32
    o_ref[...] = o.astype(o_ref.dtype).reshape(o_ref.shape)


# ---------------------------------------------------------------------------
# Generation-aware VMEM budgets & Lk-aware tile picking
# ---------------------------------------------------------------------------
def _vmem_config():
    """(picker working-set budget, Mosaic vmem_limit_bytes), generation-aware."""
    try:
        cap = int(pltpu.get_tpu_info().vmem_capacity_bytes)  # v5e/v6e: 128 MiB, v7x: 64 MiB
    except Exception:
        cap = 64 * 1024 * 1024  # conservative fallback: assume v7x-sized VMEM
    budget = max(8 * 1024 * 1024, cap // 4)                 # v7x ~16 MiB, v6e/v5e ~32 MiB
    limit = min(cap * 3 // 4, cap - 8 * 1024 * 1024)        # v7x ~48 MiB, v6e/v5e ~96 MiB
    limit = max(limit, 16 * 1024 * 1024)
    return budget, limit


def _per_step_vmem_bytes(bt, tq, Lk, Dk, Dv, in_bytes, o_bytes, a_bytes):
    # Double-buffered I/O blocks (BlockSpec pipelining) + f32 softmax
    # intermediates (s, e, attn). Lk-aware: k/v blocks and the score tile grow with Lk.
    io = bt * (tq * Dk * in_bytes            # q block
               + Lk * (Dk + Dv) * in_bytes   # k, v blocks (invariant across Lq tiles)
               + tq * Dv * o_bytes           # output block
               + tq * Lk * a_bytes)          # attn block
    interm = bt * 3 * 4 * tq * Lk
    return 2 * io + interm


def _divisors_desc(n):
    return [d for d in range(n, 0, -1) if n % d == 0]


def _q_tile_candidates(Lq):
    cap = min(Lq, 512)  # measured: ~512-wide tiles reach ~85% of HBM roofline
    cands = [t for t in _divisors_desc(Lq) if t <= cap]
    mxu = [t for t in cands if t % 128 == 0]                  # MXU / lane friendly
    sub = [t for t in cands if t % 8 == 0 and t % 128 != 0]   # sublane aligned
    rest = [t for t in cands if t % 8 != 0]
    return (mxu + sub + rest) or [Lq]


def _pick_tiles(B, Lq, Lk, Dk, Dv, in_bytes, o_bytes, a_bytes, budget):
    """Jointly pick (bt, tq) so the Lk-aware VMEM estimate fits the budget."""
    q_cands = _q_tile_candidates(Lq)
    b_cands = _divisors_desc(B)
    pick = None
    for tq in q_cands:                 # prefer big, aligned q tiles ...
        for bt in b_cands:             # ... then the biggest batch tile that fits
            if _per_step_vmem_bytes(bt, tq, Lk, Dk, Dv,
                                    in_bytes, o_bytes, a_bytes) <= budget:
                pick = (bt, tq)
                break
        if pick is not None:
            break
    if pick is None:
        # Even (bt=1, smallest tq) exceeds the budget (very long Lk): take the
        # smallest working set and rely on the vmem_limit headroom.
        # TODO(synk): add an Lk grid axis (online softmax) for very long len_k;
        # blocked by the module's mandatory full attns output.
        pick = (1, q_cands[-1])
    bt, tq = pick

    # Keep >= 2 grid programs when the shape allows so both v7x TensorCores (and
    # megacore on older gens) get work. Prefer splitting the Lq axis: k/v blocks
    # are invariant along it, so no extra DMA is paid.
    while (B // bt) * (Lq // tq) < 2:
        if tq > 1 and Lq // tq < Lq:
            tq = max(d for d in _divisors_desc(Lq) if d < tq)
        elif bt > 1:
            bt = max(d for d in _divisors_desc(B) if d < bt)
        else:
            break
    return bt, tq


# ---------------------------------------------------------------------------
# pallas_call builder
# ---------------------------------------------------------------------------
def _build_and_run(q, k, v, temperature, bt, tq, mxu_dtype, attn_dtype,
                   flatten_o, flatten_a, vmem_limit):
    B, Lq, Dk = q.shape
    _, Lk, _ = k.shape
    _, _, Dv = v.shape
    out_dtype = q.dtype

    kernel = functools.partial(_sdpa_kernel,
                               inv_temperature=1.0 / float(temperature),
                               mxu_dtype=mxu_dtype)

    # Lane-dense output slabs when Dv / Lk are sub-128: unmasked vst instead of
    # masked partial stores (the attns writeback dominates HBM traffic here).
    if flatten_o:
        o_shape = jax.ShapeDtypeStruct((B, Lq * Dv), out_dtype)
        o_spec = pl.BlockSpec((bt, tq * Dv), lambda b, i: (b, i))
    else:
        o_shape = jax.ShapeDtypeStruct((B, Lq, Dv), out_dtype)
        o_spec = pl.BlockSpec((bt, tq, Dv), lambda b, i: (b, i, 0))

    if flatten_a:
        a_shape = jax.ShapeDtypeStruct((B, Lq * Lk), attn_dtype)
        a_spec = pl.BlockSpec((bt, tq * Lk), lambda b, i: (b, i))
    else:
        a_shape = jax.ShapeDtypeStruct((B, Lq, Lk), attn_dtype)
        a_spec = pl.BlockSpec((bt, tq, Lk), lambda b, i: (b, i, 0))

    # Advisory cost estimate so XLA can schedule surrounding ops around the call.
    cost = pl.CostEstimate(
        flops=2 * B * Lq * Lk * (Dk + Dv),
        transcendentals=B * Lq * Lk,
        bytes_accessed=(q.size * q.dtype.itemsize
                        + k.size * k.dtype.itemsize
                        + v.size * v.dtype.itemsize
                        + B * Lq * Dv * jnp.dtype(out_dtype).itemsize
                        + B * Lq * Lk * jnp.dtype(attn_dtype).itemsize),
    )

    grid_spec = pl.GridSpec(
        # Grid ordering matters: batch axis OUTER, Lq-tile axis INNER. The k/v
        # index_maps are invariant in the inner axis, so Pallas skips re-DMAing
        # k/v across consecutive Lq tiles. Do not reorder to (Lq, B).
        grid=(B // bt, Lq // tq),
        in_specs=[
            pl.BlockSpec((bt, tq, Dk), lambda b, i: (b, i, 0)),
            pl.BlockSpec((bt, Lk, Dk), lambda b, i: (b, 0, 0)),  # reused across Lq tiles
            pl.BlockSpec((bt, Lk, Dv), lambda b, i: (b, 0, 0)),  # reused across Lq tiles
        ],
        out_specs=(o_spec, a_spec),
    )

    out, attns = pl.pallas_call(
        kernel,
        out_shape=(o_shape, a_shape),
        grid_spec=grid_spec,
        compiler_params=pltpu.CompilerParams(
            dimension_semantics=("parallel", "parallel"),
            vmem_limit_bytes=int(vmem_limit),
        ),
        cost_estimate=cost,
    )(q, k, v)

    if flatten_o:
        out = out.reshape(B, Lq, Dv)       # free: contiguous metadata reshape
    if flatten_a:
        attns = attns.reshape(B, Lq, Lk)
    return out, attns


# ---------------------------------------------------------------------------
# Public wrapper
# ---------------------------------------------------------------------------
def scale_dot_product_attention(q, k, v, temperature, *,
                                attn_dtype=None, use_bf16_matmul=False,
                                lane_dense_outputs=True):
    """q: [B, Lq, Dk], k: [B, Lk, Dk], v: [B, Lk, Dv]
       -> (output [B, Lq, Dv], attns [B, Lq, Lk])

    attn_dtype:        dtype for the emitted attns (default: input dtype). Pass
                       jnp.bfloat16 for f32 inputs to halve the quadratic writeback.
    use_bf16_matmul:   cast MXU operands to bf16 (f32 accumulation) for f32 inputs.
    lane_dense_outputs: store outputs as lane-dense [bt, tq*D] slabs when Dv/Lk < 128.
    """
    B, Lq, Dk = q.shape
    _, Lk, _ = k.shape
    _, _, Dv = v.shape

    out_dtype = jnp.dtype(q.dtype)
    attn_dtype = out_dtype if attn_dtype is None else jnp.dtype(attn_dtype)
    mxu_dtype = jnp.bfloat16 if (use_bf16_matmul and out_dtype == jnp.float32) else None

    budget, vmem_limit = _vmem_config()
    bt, tq = _pick_tiles(B, Lq, Lk, Dk, Dv,
                         out_dtype.itemsize, out_dtype.itemsize, attn_dtype.itemsize,
                         budget)

    # Lane-dense layout is only used when it is cleanly expressible: flattened
    # row is a 128-lane multiple and the block sublane dim is 8-aligned or full.
    sublane_ok = (bt % 8 == 0) or (bt == B)
    flatten_o = (lane_dense_outputs and Dv % 128 != 0
                 and (tq * Dv) % 128 == 0 and sublane_ok)
    flatten_a = (lane_dense_outputs and Lk % 128 != 0
                 and (tq * Lk) % 128 == 0 and sublane_ok)

    try:
        return _build_and_run(q, k, v, temperature, bt, tq, mxu_dtype, attn_dtype,
                              flatten_o, flatten_a, vmem_limit)
    except Exception:
        if not (flatten_o or flatten_a):
            raise
        # Fallback: if this Mosaic version cannot lower the minor-dim-merge
        # reshape used for the lane-dense store, retry with the plain layout.
        return _build_and_run(q, k, v, temperature, bt, tq, mxu_dtype, attn_dtype,
                              False, False, vmem_limit)


# ---------------------------------------------------------------------------
# Reference + self-test
# ---------------------------------------------------------------------------
def _reference(q, k, v, temperature):
    s = jnp.einsum("bqd,bkd->bqk", q, k) / temperature
    a = jax.nn.softmax(s, axis=-1)
    o = jnp.einsum("bqk,bkd->bqd", a, v)
    return o, a


if __name__ == "__main__":
    # Small shapes consistent with the module's forward: B = num_heads * batch = 4*2.
    B, Lq, Lk, Dk, Dv = 8, 16, 16, 32, 32
    temperature = float(Dk) ** 0.5

    key = jax.random.PRNGKey(0)
    kq, kk, kv = jax.random.split(key, 3)
    q = jax.random.normal(kq, (B, Lq, Dk), dtype=jnp.float32)
    k = jax.random.normal(kk, (B, Lk, Dk), dtype=jnp.float32)
    v = jax.random.normal(kv, (B, Lk, Dv), dtype=jnp.float32)

    out, attns = scale_dot_product_attention(q, k, v, temperature)
    jax.block_until_ready((out, attns))

    ref_out, ref_attns = _reference(q, k, v, temperature)

    assert out.shape == (B, Lq, Dv) and attns.shape == (B, Lq, Lk)
    # Exact softmax => attention rows sum to 1 (up to f32 rounding).
    assert jnp.allclose(jnp.sum(attns.astype(jnp.float32), axis=-1), 1.0,
                        atol=1e-3, rtol=1e-3)
    # Tolerance sized to cover MXU / XLA default f32 matmul precision differences
    # between the kernel and the jnp reference on hardware; interpret mode and
    # full-precision paths match to ~1e-6.
    assert jnp.allclose(out, ref_out, atol=2e-2, rtol=2e-2)
    assert jnp.allclose(attns, ref_attns, atol=2e-2, rtol=2e-2)

    print("KERNEL_OK")
</pallas_src>

<mosaic_0001>
module attributes {stable_mosaic.version = 11 : i64} {
  func.func @_sdpa_kernel(%arg0: i32, %arg1: i32, %arg2: memref<8x8x32xf32, #tpu.memory_space<vmem>>, %arg3: memref<8x16x32xf32, #tpu.memory_space<vmem>>, %arg4: memref<8x16x32xf32, #tpu.memory_space<vmem>>, %arg5: memref<8x256xf32, #tpu.memory_space<vmem>>, %arg6: memref<8x128xf32, #tpu.memory_space<vmem>>) attributes {dimension_semantics = [#tpu.dimension_semantics<parallel>, #tpu.dimension_semantics<parallel>], iteration_bounds = array<i64: 1, 2>, scalar_prefetch = 0 : i64, scratch_operands = 0 : i64, tpu.core_type = #tpu.core_type<tc>, window_params = [{transform_indices = @transform_0, window_bounds = array<i64: 8, 8, 32>}, {transform_indices = @transform_1, window_bounds = array<i64: 8, 16, 32>}, {transform_indices = @transform_2, window_bounds = array<i64: 8, 16, 32>}, {transform_indices = @transform_3, window_bounds = array<i64: 8, 256>}, {transform_indices = @transform_4, window_bounds = array<i64: 8, 128>}]} {
    %c0 = arith.constant 0 : index
    %c0_0 = arith.constant 0 : index
    %c0_1 = arith.constant 0 : index
    %0 = vector.load %arg2[%c0, %c0_0, %c0_1] : memref<8x8x32xf32, #tpu.memory_space<vmem>>, vector<8x8x32xf32>
    %c0_2 = arith.constant 0 : index
    %c0_3 = arith.constant 0 : index
    %c0_4 = arith.constant 0 : index
    %1 = vector.load %arg3[%c0_2, %c0_3, %c0_4] : memref<8x16x32xf32, #tpu.memory_space<vmem>>, vector<8x16x32xf32>
    %c0_5 = arith.constant 0 : index
    %c0_6 = arith.constant 0 : index
    %c0_7 = arith.constant 0 : index
    %2 = vector.load %arg4[%c0_5, %c0_6, %c0_7] : memref<8x16x32xf32, #tpu.memory_space<vmem>>, vector<8x16x32xf32>
    %cst = arith.constant 0.176776692 : f32
    %3 = vector.broadcast %cst : f32 to vector<8x8x32xf32>
    %4 = arith.mulf %0, %3 : vector<8x8x32xf32>
    %cst_8 = arith.constant dense<0.000000e+00> : vector<8x8x16xf32>
    %5 = tpu.matmul %4, %1, %cst_8 {dimension_numbers = #tpu.dot_dimension_numbers<[2], [2], [1], [1], [0, 0, 0, 1, 1, 1], [0], [0]>} : vector<8x8x32xf32>, vector<8x16x32xf32>, vector<8x8x16xf32> -> vector<8x8x16xf32>
    %cst_9 = arith.constant dense<0xFF800000> : vector<8x8xf32>
    %6 = vector.multi_reduction <maximumf>, %5, %cst_9 [2] : vector<8x8x16xf32> to vector<8x8xf32>
    %7 = vector.shape_cast %6 : vector<8x8xf32> to vector<8x8x1xf32>
    %8 = vector.broadcast %7 : vector<8x8x1xf32> to vector<8x8x16xf32>
    %9 = arith.subf %5, %8 : vector<8x8x16xf32>
    %10 = math.exp %9 : vector<8x8x16xf32>
    %cst_10 = arith.constant dense<0.000000e+00> : vector<8x8xf32>
    %11 = vector.multi_reduction <add>, %10, %cst_10 [2] : vector<8x8x16xf32> to vector<8x8xf32>
    %12 = vector.shape_cast %11 : vector<8x8xf32> to vector<8x8x1xf32>
    %cst_11 = arith.constant 1.000000e+00 : f32
    %13 = vector.broadcast %cst_11 : f32 to vector<8x8x1xf32>
    %14 = arith.divf %13, %12 : vector<8x8x1xf32>
    %15 = vector.broadcast %14 : vector<8x8x1xf32> to vector<8x8x16xf32>
    %16 = arith.mulf %10, %15 : vector<8x8x16xf32>
    %17 = vector.shape_cast %16 : vector<8x8x16xf32> to vector<8x128xf32>
    %c0_12 = arith.constant 0 : index
    %c0_13 = arith.constant 0 : index
    %18 = vector.load %arg6[%c0_12, %c0_13] : memref<8x128xf32, #tpu.memory_space<vmem>>, vector<8x128xf32>
    tpu.vector_store %arg6[%c0_12, %c0_13], %17 {strides = array<i32>} : memref<8x128xf32, #tpu.memory_space<vmem>>, vector<8x128xf32>,
    %cst_14 = arith.constant dense<0.000000e+00> : vector<8x8x32xf32>
    %19 = tpu.matmul %16, %2, %cst_14 {dimension_numbers = #tpu.dot_dimension_numbers<[2], [1], [1], [2], [0, 0, 0, 1, 1, 2], [0], [0]>} : vector<8x8x16xf32>, vector<8x16x32xf32>, vector<8x8x32xf32> -> vector<8x8x32xf32>
    %20 = vector.shape_cast %19 : vector<8x8x32xf32> to vector<8x256xf32>
    %c0_15 = arith.constant 0 : index
    %c0_16 = arith.constant 0 : index
    %21 = vector.load %arg5[%c0_15, %c0_16] : memref<8x256xf32, #tpu.memory_space<vmem>>, vector<8x256xf32>
    tpu.vector_store %arg5[%c0_15, %c0_16], %20 {strides = array<i32>} : memref<8x256xf32, #tpu.memory_space<vmem>>, vector<8x256xf32>,
    return
  }
  func.func @transform_0(%arg0: i32, %arg1: i32) -> (i32, i32, i32) {
    %c0_i32 = arith.constant 0 : i32
    %c0_i32_0 = arith.constant 0 : i32
    return %arg0, %arg1, %c0_i32 : i32, i32, i32
  }
  func.func @transform_1(%arg0: i32, %arg1: i32) -> (i32, i32, i32) {
    %c0_i32 = arith.constant 0 : i32
    %c0_i32_0 = arith.constant 0 : i32
    %c0_i32_1 = arith.constant 0 : i32
    return %arg0, %c0_i32, %c0_i32_0 : i32, i32, i32
  }
  func.func @transform_2(%arg0: i32, %arg1: i32) -> (i32, i32, i32) {
    %c0_i32 = arith.constant 0 : i32
    %c0_i32_0 = arith.constant 0 : i32
    %c0_i32_1 = arith.constant 0 : i32
    return %arg0, %c0_i32, %c0_i32_0 : i32, i32, i32
  }
  func.func @transform_3(%arg0: i32, %arg1: i32) -> (i32, i32) {
    %c0_i32 = arith.constant 0 : i32
    return %arg0, %arg1 : i32, i32
  }
  func.func @transform_4(%arg0: i32, %arg1: i32) -> (i32, i32) {
    %c0_i32 = arith.constant 0 : i32
    return %arg0, %arg1 : i32, i32
  }
}

module attributes {stable_mosaic.version = 11 : i64} {
  func.func @_sdpa_kernel(%arg0: i32, %arg1: i32, %arg2: memref<8x8x32xf32, #tpu.memory_space<vmem>>, %arg3: memref<8x16x32xf32, #tpu.memory_space<vmem>>, %arg4: memref<8x16x32xf32, #tpu.memory_space<vmem>>, %arg5: memref<8x8x32xf32, #tpu.memory_space<vmem>>, %arg6: memref<8x8x16xf32, #tpu.memory_space<vmem>>) attributes {dimension_semantics = [#tpu.dimension_semantics<parallel>, #tpu.dimension_semantics<parallel>], iteration_bounds = array<i64: 1, 2>, scalar_prefetch = 0 : i64, scratch_operands = 0 : i64, tpu.core_type = #tpu.core_type<tc>, window_params = [{transform_indices = @transform_0, window_bounds = array<i64: 8, 8, 32>}, {transform_indices = @transform_1, window_bounds = array<i64: 8, 16, 32>}, {transform_indices = @transform_2, window_bounds = array<i64: 8, 16, 32>}, {transform_indices = @transform_3, window_bounds = array<i64: 8, 8, 32>}, {transform_indices = @transform_4, window_bounds = array<i64: 8, 8, 16>}]} {
    %c0 = arith.constant 0 : index
    %c0_0 = arith.constant 0 : index
    %c0_1 = arith.constant 0 : index
    %0 = vector.load %arg2[%c0, %c0_0, %c0_1] : memref<8x8x32xf32, #tpu.memory_space<vmem>>, vector<8x8x32xf32>
    %c0_2 = arith.constant 0 : index
    %c0_3 = arith.constant 0 : index
    %c0_4 = arith.constant 0 : index
    %1 = vector.load %arg3[%c0_2, %c0_3, %c0_4] : memref<8x16x32xf32, #tpu.memory_space<vmem>>, vector<8x16x32xf32>
    %c0_5 = arith.constant 0 : index
    %c0_6 = arith.constant 0 : index
    %c0_7 = arith.constant 0 : index
    %2 = vector.load %arg4[%c0_5, %c0_6, %c0_7] : memref<8x16x32xf32, #tpu.memory_space<vmem>>, vector<8x16x32xf32>
    %cst = arith.constant 0.176776692 : f32
    %3 = vector.broadcast %cst : f32 to vector<8x8x32xf32>
    %4 = arith.mulf %0, %3 : vector<8x8x32xf32>
    %cst_8 = arith.constant dense<0.000000e+00> : vector<8x8x16xf32>
    %5 = tpu.matmul %4, %1, %cst_8 {dimension_numbers = #tpu.dot_dimension_numbers<[2], [2], [1], [1], [0, 0, 0, 1, 1, 1], [0], [0]>} : vector<8x8x32xf32>, vector<8x16x32xf32>, vector<8x8x16xf32> -> vector<8x8x16xf32>
    %cst_9 = arith.constant dense<0xFF800000> : vector<8x8xf32>
    %6 = vector.multi_reduction <maximumf>, %5, %cst_9 [2] : vector<8x8x16xf32> to vector<8x8xf32>
    %7 = vector.shape_cast %6 : vector<8x8xf32> to vector<8x8x1xf32>
    %8 = vector.broadcast %7 : vector<8x8x1xf32> to vector<8x8x16xf32>
    %9 = arith.subf %5, %8 : vector<8x8x16xf32>
    %10 = math.exp %9 : vector<8x8x16xf32>
    %cst_10 = arith.constant dense<0.000000e+00> : vector<8x8xf32>
    %11 = vector.multi_reduction <add>, %10, %cst_10 [2] : vector<8x8x16xf32> to vector<8x8xf32>
    %12 = vector.shape_cast %11 : vector<8x8xf32> to vector<8x8x1xf32>
    %cst_11 = arith.constant 1.000000e+00 : f32
    %13 = vector.broadcast %cst_11 : f32 to vector<8x8x1xf32>
    %14 = arith.divf %13, %12 : vector<8x8x1xf32>
    %15 = vector.broadcast %14 : vector<8x8x1xf32> to vector<8x8x16xf32>
    %16 = arith.mulf %10, %15 : vector<8x8x16xf32>
    %c0_12 = arith.constant 0 : index
    %c0_13 = arith.constant 0 : index
    %c0_14 = arith.constant 0 : index
    %17 = vector.load %arg6[%c0_12, %c0_13, %c0_14] : memref<8x8x16xf32, #tpu.memory_space<vmem>>, vector<8x8x16xf32>
    tpu.vector_store %arg6[%c0_12, %c0_13, %c0_14], %16 {strides = array<i32>} : memref<8x8x16xf32, #tpu.memory_space<vmem>>, vector<8x8x16xf32>,
    %cst_15 = arith.constant dense<0.000000e+00> : vector<8x8x32xf32>
    %18 = tpu.matmul %16, %2, %cst_15 {dimension_numbers = #tpu.dot_dimension_numbers<[2], [1], [1], [2], [0, 0, 0, 1, 1, 2], [0], [0]>} : vector<8x8x16xf32>, vector<8x16x32xf32>, vector<8x8x32xf32> -> vector<8x8x32xf32>
    %c0_16 = arith.constant 0 : index
    %c0_17 = arith.constant 0 : index
    %c0_18 = arith.constant 0 : index
    %19 = vector.load %arg5[%c0_16, %c0_17, %c0_18] : memref<8x8x32xf32, #tpu.memory_space<vmem>>, vector<8x8x32xf32>
    tpu.vector_store %arg5[%c0_16, %c0_17, %c0_18], %18 {strides = array<i32>} : memref<8x8x32xf32, #tpu.memory_space<vmem>>, vector<8x8x32xf32>,
    return
  }
  func.func @transform_0(%arg0: i32, %arg1: i32) -> (i32, i32, i32) {
    %c0_i32 = arith.constant 0 : i32
    %c0_i32_0 = arith.constant 0 : i32
    return %arg0, %arg1, %c0_i32 : i32, i32, i32
  }
  func.func @transform_1(%arg0: i32, %arg1: i32) -> (i32, i32, i32) {
    %c0_i32 = arith.constant 0 : i32
    %c0_i32_0 = arith.constant 0 : i32
    %c0_i32_1 = arith.constant 0 : i32
    return %arg0, %c0_i32, %c0_i32_0 : i32, i32, i32
  }
  func.func @transform_2(%arg0: i32, %arg1: i32) -> (i32, i32, i32) {
    %c0_i32 = arith.constant 0 : i32
    %c0_i32_0 = arith.constant 0 : i32
    %c0_i32_1 = arith.constant 0 : i32
    return %arg0, %c0_i32, %c0_i32_0 : i32, i32, i32
  }
  func.func @transform_3(%arg0: i32, %arg1: i32) -> (i32, i32, i32) {
    %c0_i32 = arith.constant 0 : i32
    %c0_i32_0 = arith.constant 0 : i32
    return %arg0, %arg1, %c0_i32 : i32, i32, i32
  }
  func.func @transform_4(%arg0: i32, %arg1: i32) -> (i32, i32, i32) {
    %c0_i32 = arith.constant 0 : i32
    %c0_i32_0 = arith.constant 0 : i32
    return %arg0, %arg1, %c0_i32 : i32, i32, i32
  }
}

</mosaic_0001>

<bundles_post_ra>
// kernel: tpu_custom_call.1
= control target key start
LH: loop header
LB: loop body
LE: loop exit
PB: predicated region body
PF: predicated region fallthrough
CT: control target
= control target key end

     0   :  { %s3207_s0 = inlined_call_operand.hbm [shape: f32[8,16,32], index: 0, kind: input, shape index: {}]   ;;  %s3208_s1 = inlined_call_operand.hbm [shape: f32[8,16,32], index: 1, kind: input, shape index: {}]   ;;  %s3209_s2 = inlined_call_operand.hbm [shape: f32[8,16,32], index: 2, kind: input, shape index: {}]   ;;  %s3210_s3 = inlined_call_operand.hbm [shape: f32[8,512], index: 3, kind: output, shape index: {0}]   ;;  %s3211_s4 = inlined_call_operand.hbm [shape: f32[8,256], index: 4, kind: output, shape index: {1}]  }
   0x1   :  { %3217 = sst [smem:[#allocation15_spill]] %s3208_s1 }
   0x2   :  { %3218 = sst [smem:[#allocation16_spill]] %s3209_s2 }
   0x3   :  { %10 = vsyncpa [#allocation3], 0 }
   0x4   :  { %12 = vsyncpa [#allocation3 + $0x1], 0 }
   0x5   :  { %13 = vsyncpa [#allocation6], 0 }
   0x6   :  { %14 = vsyncpa [#allocation4], 0 }
   0x7   :  { %16 = vsyncpa [#allocation4 + $0x1], 0 }
   0x8   :  { %17 = vsyncpa [#allocation10], 0 }
   0x9   :  { %19 = vsyncpa [#allocation10 + $0x1], 0  ;;  %s2770_s15 = smov 0   ;;  %s2772_s16 = smov 0  }
   0xa   :  { %s2774_s17 = smov 0   ;;  %s2776_s18 = smov 0  }
   0xb   :  { %s2778_s19 = smov 0   ;;  %s2780_s20 = smov 0  }
   0xc LB: > { %s2182_s21 = sadd.s32 4294967295, %s2724_s20   ;;  %s2183_s22 = sadd.s32 4294967294, %s2724_s20   ;;  %s2724_s20 = sphi %s2780_s20, %s25_s20   ;;  %s2720_s19 = sphi %s2778_s19, %s3239_s19   ;;  %s2716_s18 = sphi %s2776_s18, %s3238_s18   ;;  %s2712_s17 = sphi %s2774_s17, %s3237_s17   ;;  %s2708_s16 = sphi %s2772_s16, %s3236_s16   ;;  %s2704_s15 = sphi %s2770_s15, %s3235_s15  }
   0xd   : > { %p53_p0 = scmp.ne.s32.totalorder %s2712_s17, %s2708_s16  ;;  %p54_p1 = scmp.eq.s32.totalorder %s2724_s20, 0 }
   0xe   : > { %p59_p2 = scmp.ne.s32.totalorder %s2708_s16, %s2704_s15  ;;  %p2807_p3 = scmp.eq.s32.totalorder %s2182_s21, 0 }
   0xf   : > { %p2811_p4 = por %p54_p1, %p53_p0  ;;  %p137_p5 = scmp.eq.s32.totalorder %s2182_s21, 1 }
  0x10   : > { %s3219_s23 = scalar_select %p2807_p3, 1, 0 }
  0x11   : > { %p2817_p6 = por %p2807_p3, %p59_p2  ;;  %p143_p7 = scmp.eq.s32.totalorder %s2183_s22, 1 }
  0x12   : > { %p2821_p8 = por %p137_p5, %p53_p0  ;;  %p2184_p9 = scmp.ge.s32.totalorder %s2724_s20, 1 }
  0x13   : > { %p2826_p10 = por %p143_p7, %p59_p2  ;;  %p178_p11 = scmp.lt.s32.totalorder %s2724_s20, 3 }
  0x14   : > { %s3222_s26 = scalar_select %p2821_p8, 1, 0 }
  0x15   : > { %s3223_s27 = scalar_select %p2826_p10, 1, 0 }
  0x16   : > { %p2831_p12 = pnand %p2184_p9, %p178_p11  ;;  %s2726_s29 = smov [#allocation5]  }
  0x17   : > { %s194_s30 = sshll.u32 %s2726_s29, 4  ;;  %p2430_p1 = scmp.lt.s32.totalorder %s2724_s20, 2  ;;  %s195_s30 = int_to_ptr.vmem [resolvable:$true] %s194_s30 }
  0x18   : > { %p2410_p13 = pneg %p2831_p12  ;;  %s2727_s7 = smov [#allocation7]  }
  0x19   : > { %p2847_p2 = pnand %p2430_p1, %p2811_p4  ;;  %s211_s8 = sshll.u32 %s2727_s7, 4  ;;  %s212_s8 = int_to_ptr.vmem [resolvable:$true] %s211_s8 }
  0x1a   : > { %p2841_p5 = pnand %p2410_p13, %p2807_p3  ;;  %s2541_s9 = scalar_lea.vmem %s195_s30, 2048 }
  0x1b   : > { %p2542_p9 = scmp.ne.s32.totalorder %s195_s30, %s2541_s9  ;;  %p2549_p0 = scmp.lt.s32.totalorder %s195_s30, %s195_s30 }
  0x1c   : > { %p2532_p7 = pneg %p2841_p5  ;;  %p2550_p10 = scmp.lt.s32.totalorder %s2541_s9, %s2541_s9 }
  0x1e   : > { %p2544_p11 = pnand %p2542_p9, %p2532_p7  ;;  %p2551_p8 = por %p2550_p10, %p2549_p0 }
  0x20   : > { %p2545_p13 = pneg %p2544_p11 }
  0x22   : > { %p2552_p3 = pnand %p2551_p8, %p2545_p13 }
  0x24   : > { %2555 = shalt.err (!%p2552_p3)
}
  0x25   : > { %s3215_s10 = smov 128   ;;  %s3216_s11 = smov 8  }
  0x26   : > { %s3227_s1 = sld [smem:[#allocation15_spill]]  ;;  %s2567_s14 = scalar_lea.vmem %s212_s8, 2048 }
  0x27   : > { %p2568_p4 = scmp.ne.s32.totalorder %s212_s8, %s2567_s14  ;;  %p2575_p8 = scmp.lt.s32.totalorder %s212_s8, %s212_s8 }
  0x28   : > { %p2576_p3 = scmp.lt.s32.totalorder %s2567_s14, %s2567_s14 }
  0x29   : > { %p2570_p1 = pnand %p2568_p4, %p2532_p7 }
  0x2a   : > { %p2577_p0 = por %p2576_p3, %p2575_p8 }
  0x2b   : > { %p2571_p10 = pneg %p2570_p1 }
  0x2c   : > { %2413 = dma.hbm_to_vmem [thread:$0]  (!%p2841_p5), %s3227_s1, 2048, %s195_s30, [#allocation6], %s3215_s10, %s3215_s10, %s3216_s11  }
  0x2d   : > { %p2578_p9 = pnand %p2577_p0, %p2571_p10 }
  0x2f   : > { %2581 = shalt.err (!%p2578_p9)
}
  0x30   : > { %s3228_s2 = sld [smem:[#allocation16_spill]]  ;;  %s46_s24 = sadd.s32 1, %s2712_s17 }
  0x31   : > { %s34_s29 = sadd.s32 1, %s2720_s19  ;;  %s225_s30 = sand.u32 1, %s2712_s17  }
  0x32   : > { %p35_p7 = scmp.ge.s32.totalorder %s34_s29, 2  ;;  %s2188_s7 = sshll.u32 %s225_s30, 6 }
  0x33   : > { %s2189_s5 = sshll.u32 %s2720_s19, 7  ;;  %s229_s21 = scalar_lea.vmem [#allocation2], %s2188_s7 }
  0x34   : > { %s3241_s29 = smov (%p35_p7, %s34_s29), 0  ;;  %s237_s13 = scalar_lea.hbm %s3207_s0, %s2189_s5 }
  0x35   : > { %s42_s14 = ssub.s32 %s2720_s19, %s3241_s29  ;;  %s238_s22 = sshll.u32 %s229_s21, 4  ;;  %s239_s22 = int_to_ptr.vmem [resolvable:$true] %s238_s22 }
  0x36   : > { %2416 = dma.hbm_to_vmem [thread:$0]  (!%p2841_p5), %s3228_s2, 2048, %s212_s8, [#allocation6], %s3215_s10, %s3215_s10, %s3216_s11  }
  0x37   : > { %p44_p11 = scmp.eq.s32.totalorder %s42_s14, 0  ;;  %s226_s10 = scalar_lea.sflag [#allocation3], %s225_s30 }
  0x38   : > { %p2584_p5 = pneg %p2847_p2  ;;  %s2595_s11 = scalar_lea.vmem %s239_s22, 1024 }
  0x39   : > { %s2887_s8 = scalar_select %p44_p11, %s2712_s17, %s46_s24  }
  0x3a   : > { %p2596_p13 = scmp.ne.s32.totalorder %s239_s22, %s2595_s11  ;;  %s2730_s1 = smov [#allocation2]  }
  0x3b   : > { %s2600_s2 = sshll.u32 %s2730_s1, 4  ;;  %s2601_s2 = int_to_ptr.vmem [resolvable:$false] %s2600_s2 }
  0x3c   : > { %p2598_p4 = pnand %p2596_p13, %p2584_p5  ;;  %s2602_s9 = scalar_lea.vmem %s2601_s2, 2048 }
  0x3d   : > { %p2603_p10 = scmp.lt.s32.totalorder %s239_s22, %s2601_s2  ;;  %p2604_p8 = scmp.lt.s32.totalorder %s2602_s9, %s2595_s11 }
  0x3e   : > { %p2599_p1 = pneg %p2598_p4 }
  0x3f   : > { %p2605_p3 = por %p2604_p8, %p2603_p10 }
  0x41   : > { %p2606_p0 = pnand %p2605_p3, %p2599_p1 }
  0x43   : > { %2609 = shalt.err (!%p2606_p0)
}
  0x44   : > { %s2731_s7 = smov 256   ;;  %s3229_s24 = smov 8  }
  0x45   : > { %s3230_s30 = smov 128   ;;  %250 = sbr.rel (%p2831_p12) target bundleno = 968 (0x3c8), region = 32 }
  0x46   : > { %2420 = dma.hbm_to_vmem [thread:$0]  (!%p2847_p2), %s237_s13, 1024, %s239_s22, %s226_s10, %s2731_s7, %s3230_s30, %s3229_s24  }
  0x47   : > { %s2898_s5 = sand.u32 (!%p2831_p12), 1, %s2708_s16  }
  0x48   : > { %s2191_s1 = sshll.u32 (!%p2831_p12), %s2898_s5, 6  ;;  %s253_s2 = scalar_lea.sflag (!%p2831_p12), [#allocation3], %s2898_s5 }
  0x49   : > { %s2902_s11 = scalar_lea.vmem (!%p2831_p12), [#allocation2], %s2191_s1 }
  0x4a   : > { %2687 = dma.done.wait (%p2817_p6), %s253_s2, 1024  }
  0x4b   : > { %2689 = vsyncadd (%p2817_p6), %s253_s2, 4294966272  ;;  %p3231_p2 = scmp.ne.s32.totalorder %s3219_s23, 0 }
  0x4d   : > { %2691 = dma.done.wait (%p3231_p2), [#allocation6], 4096  }
  0x4e   : > { %2693 = vsyncadd (%p3231_p2), [#allocation6], 4294963200  ;;  %v2732_v0 = vmov 0.0   ;;  %vm2733_vm0 = vmmov 0   ;;  %vm346_vm1 = vcmask 261120   ;;  %v307_v1 = vld [vmem:[#allocation5 + $0x8] sm:$0xff] }
  0x4f   : > { %2284 = vmatprep.subr.mxu0 %v2732_v0  ;;  %2291 = vmatprep.subr.mxu1 %v2732_v0  ;;  %v309_v2 = vld [vmem:[#allocation5 + $0x18] sm:$0xff]  ;;  %v298_v3 = vld [vmem:[%s2902_s11] sm:$0xff]  ;;  %v299_v4 = vld [vmem:[%s2902_s11 + $0x8] sm:$0xff]  ;;  %vm979_vm2 = vcmask 130048   ;;  %s2736_s23 = smov 32   ;;  %s2737_s25 = smov 16  }
  0x50   : > { %2288 = vmatprep.mubr.msk.f32.mxu0 %vm2733_vm0, %v2732_v0  ;;  %2295 = vmatprep.mubr.msk.f32.mxu1 %vm2733_vm0, %v2732_v0  ;;  %v306_v5 = vld [vmem:[#allocation5] sm:$0xff]  ;;  %v308_v6 = vld [vmem:[#allocation5 + $0x10] sm:$0xff]  ;;  %v338_v7 = vmul.f32 0.17677669, %v298_v3  ;;  %v339_v8 = vmul.f32 0.17677669, %v299_v4 }
  0x51   : > { %2285 = vmatpush3.xpose.msk.msra.mxu0 %vm346_vm1, %v307_v1  ;;  %2292 = vmatpush3.xpose.msk.msra.mxu1 %vm346_vm1, %v309_v2  ;;  %v311_v9 = vld [vmem:[#allocation5 + $0x28] sm:$0xff]  ;;  %v313_v10 = vld [vmem:[#allocation5 + $0x38] sm:$0xff]  ;;  %v300_v11 = vld [vmem:[%s2902_s11 + $0x10] sm:$0xff]  ;;  %s2738_s28 = smov 48   ;;  %s2739_s6 = smov 80   ;;  %vm1242_vm3 = vcmask 392192  }
  0x52   : > { %2286 = vmatprep.subr.mxu0 %v2732_v0  ;;  %2293 = vmatprep.subr.mxu1 %v2732_v0  ;;  %v301_v12 = vld [vmem:[%s2902_s11 + $0x18] sm:$0xff]  ;;  %v310_v13 = vld [vmem:[#allocation5 + $0x20] sm:$0xff]  ;;  %v312_v14 = vld [vmem:[#allocation5 + $0x30] sm:$0xff]  ;;  %v340_v15 = vmul.f32 0.17677669, %v300_v11  ;;  %s2740_s10 = smov 64  }
  0x53   : > { %v341_v16 = vmul.f32 0.17677669, %v301_v12  ;;  %v315_v17 = vld [vmem:[#allocation5 + $0x48] sm:$0xff]  ;;  %v317_v18 = vld [vmem:[#allocation5 + $0x58] sm:$0xff]  ;;  %v302_v19 = vld [vmem:[%s2902_s11 + $0x20] sm:$0xff]  ;;  %s2741_s12 = smov 112  }
  0x54   : > { %v303_v20 = vld [vmem:[%s2902_s11 + $0x28] sm:$0xff]  ;;  %v314_v21 = vld [vmem:[#allocation5 + $0x40] sm:$0xff]  ;;  %v316_v22 = vld [vmem:[#allocation5 + $0x50] sm:$0xff]  ;;  %v342_v23 = vmul.f32 0.17677669, %v302_v19  ;;  %s2742_s13 = smov 96  }
  0x55   : > { %2287 = vmatpush3.xpose.msk.msra.mxu0 %vm346_vm1, %v306_v5  ;;  %2294 = vmatpush3.xpose.msk.msra.mxu1 %vm346_vm1, %v308_v6  ;;  %v343_v24 = vmul.f32 0.17677669, %v303_v20  ;;  %v319_v25 = vld [vmem:[#allocation5 + $0x68] sm:$0xff]  ;;  %v321_v26 = vld [vmem:[#allocation5 + $0x78] sm:$0xff]  ;;  %v304_v27 = vld [vmem:[%s2902_s11 + $0x30] sm:$0xff]  ;;  %vm1244_vm4 = vcmask 523264  }
  0x56   : > { %2298 = vmatprep.subr.mxu0 %v2732_v0  ;;  %2305 = vmatprep.subr.mxu1 %v2732_v0  ;;  %v305_v28 = vld [vmem:[%s2902_s11 + $0x38] sm:$0xff]  ;;  %v318_v29 = vld [vmem:[#allocation5 + $0x60] sm:$0xff]  ;;  %v320_v30 = vld [vmem:[#allocation5 + $0x70] sm:$0xff]  ;;  %v344_v31 = vmul.f32 0.17677669, %v304_v27  ;;  %vm1246_vm5 = vcmask 654336  }
  0x57   : > { %v345_v32 = vmul.f32 0.17677669, %v305_v28  ;;  %s2195_s14 = sshll.u32 %s2898_s5, 3  ;;  %vm1248_vm6 = vcmask 785408   ;;  %vm1250_vm7 = vcmask 916480   ;;  %s2232_s22 = sshll.u32 %s2716_s18, 7 }
  0x58   : > { %2289 = vmatmul.mubr.msk.f32.vlgmr.msra.gmra.mxu0 %vm346_vm1, %v338_v7  ;;  %2296 = vmatmul.mubr.msk.f32.vlgmr.msra.gmra.mxu1 %vm346_vm1, %v339_v8  ;;  %s3099_s21 = scalar_lea.vmem [#allocation9], %s2195_s14  ;;  %s3120_s24 = scalar_lea.hbm %s3211_s4, %s2232_s22 }
  0x59   : > { %2299 = vmatpush3.xpose.msk.msra.mxu0 %vm346_vm1, %v311_v9  ;;  %2306 = vmatpush3.xpose.msk.msra.mxu1 %vm346_vm1, %v313_v10  ;;  %s2042_s30 = sshll.u32 %s3099_s21, 4  ;;  %s2011_s1 = scalar_lea.sflag [#allocation10], %s2898_s5  ;;  %s2043_s30 = int_to_ptr.vmem [resolvable:$true] %s2042_s30 }
  0x5a   : > { %2300 = vmatprep.subr.mxu0 %v2732_v0  ;;  %2307 = vmatprep.subr.mxu1 %v2732_v0  ;;  %s2610_s2 = scalar_lea.vmem %s2043_s30, 128  ;;  %p3232_p12 = scmp.ne.s32.totalorder %s3222_s26, 0 }
  0x5b   : > { %2302 = vmatprep.mubr.msk.f32.mxu0 %vm2733_vm0, %v2732_v0  ;;  %2309 = vmatprep.mubr.msk.f32.mxu1 %vm2733_vm0, %v2732_v0  ;;  %p2611_p6 = scmp.ne.s32.totalorder %s2043_s30, %s2610_s2  ;;  %s2743_s11 = smov [#allocation9]  }
  0x5d   : > { %2301 = vmatpush3.xpose.msk.msra.mxu0 %vm346_vm1, %v310_v13  ;;  %2308 = vmatpush3.xpose.msk.msra.mxu1 %vm346_vm1, %v312_v14  ;;  %p2612_p9 = pnand %p2611_p6, %p3232_p12 }
  0x5e   : > { %2312 = vmatprep.subr.mxu0 %v2732_v0  ;;  %2319 = vmatprep.subr.mxu1 %v2732_v0 }
  0x5f   : > { %p2613_p7 = pneg %p2612_p9 }
  0x60   : > { %2303 = vmatmul.mubr.msk.f32.vlgmr.msra.gmra.mxu0 %vm346_vm1, %v340_v15  ;;  %2310 = vmatmul.mubr.msk.f32.vlgmr.msra.gmra.mxu1 %vm346_vm1, %v341_v16 }
  0x61   : > { %2313 = vmatpush3.xpose.msk.msra.mxu0 %vm346_vm1, %v315_v17  ;;  %2320 = vmatpush3.xpose.msk.msra.mxu1 %vm346_vm1, %v317_v18 }
  0x62   : > { %2314 = vmatprep.subr.mxu0 %v2732_v0  ;;  %2321 = vmatprep.subr.mxu1 %v2732_v0 }
  0x63   : > { %2316 = vmatprep.mubr.msk.f32.mxu0 %vm2733_vm0, %v2732_v0  ;;  %2323 = vmatprep.mubr.msk.f32.mxu1 %vm2733_vm0, %v2732_v0 }
  0x65   : > { %2315 = vmatpush3.xpose.msk.msra.mxu0 %vm346_vm1, %v314_v21  ;;  %2322 = vmatpush3.xpose.msk.msra.mxu1 %vm346_vm1, %v316_v22 }
  0x66   : > { %2326 = vmatprep.subr.mxu0 %v2732_v0  ;;  %2333 = vmatprep.subr.mxu1 %v2732_v0 }
  0x68   : > { %2317 = vmatmul.mubr.msk.f32.vlgmr.msra.gmra.mxu0 %vm346_vm1, %v342_v23  ;;  %2324 = vmatmul.mubr.msk.f32.vlgmr.msra.gmra.mxu1 %vm346_vm1, %v343_v24 }
  0x69   : > { %2327 = vmatpush3.xpose.msk.msra.mxu0 %vm346_vm1, %v319_v25  ;;  %2334 = vmatpush3.xpose.msk.msra.mxu1 %vm346_vm1, %v321_v26 }
  0x6a   : > { %2328 = vmatprep.subr.mxu0 %v2732_v0  ;;  %2335 = vmatprep.subr.mxu1 %v2732_v0 }
  0x6b   : > { %2330 = vmatprep.mubr.msk.f32.mxu0 %vm2733_vm0, %v2732_v0  ;;  %2337 = vmatprep.mubr.msk.f32.mxu1 %vm2733_vm0, %v2732_v0 }
  0x6d   : > { %2329 = vmatpush3.xpose.msk.msra.mxu0 %vm346_vm1, %v318_v29  ;;  %2336 = vmatpush3.xpose.msk.msra.mxu1 %vm346_vm1, %v320_v30 }
  0x6e   : > { %2340 = vmatprep.subr.mxu0 %v2732_v0  ;;  %2347 = vmatprep.subr.mxu1 %v2732_v0 }
  0x70   : > { %2331 = vmatmul.mubr.msk.f32.vlgmr.msra.gmra.mxu0 %vm346_vm1, %v344_v31  ;;  %2338 = vmatmul.mubr.msk.f32.vlgmr.msra.gmra.mxu1 %vm346_vm1, %v345_v32  ;;  %v323_v31 = vld [vmem:[#allocation7 + $0x8] sm:$0xff]  ;;  %v322_v32 = vld [vmem:[#allocation7] sm:$0xff] }
  0x71   : > { %2344 = vmatprep.mubr.msk.f32.mxu0 %vm2733_vm0, %v2732_v0  ;;  %2351 = vmatprep.mubr.msk.f32.mxu1 %vm2733_vm0, %v2732_v0 }
  0x72   : > { %2341 = vmatpush3.msra.mxu0 %v323_v31 }
  0x73   : > { %2342 = vmatprep.subr.mxu0 %v2732_v0 }
  0x74   : > { %2343 = vmatpush3.msra.mxu0 %v322_v32 }
  0x75   : > { %2354 = vmatprep.subr.mxu0 %v2732_v0 }
 0x118   : > { %v422_v33 = vpop.f32.mrf.mxu0  ;;  %v501_v34 = vpop.f32.mrf.mxu1 }
 0x119   : > { %v980_v35 = vsel %vm979_vm2, %v422_v33, -inf  ;;  %v983_v38 = vsel %vm979_vm2, %v501_v34, -inf }
 0x11a   : > { %v2297_v36 = vpop.f32.mrf.mxu1  ;;  %981 = vmax.xlane.f32.xlu0 %v980_v35  ;;  %v2290_v37 = vpop.f32.mrf.mxu0 }
 0x11b   : > { %v325_v36 = vld [vmem:[#allocation7 + $0x18] sm:$0xff]  ;;  %v324_v37 = vld [vmem:[#allocation7 + $0x10] sm:$0xff] }
 0x11c   : > { %2348 = vmatpush3.msra.mxu1 %v325_v36 }
 0x11d   : > { %2349 = vmatprep.subr.mxu1 %v2732_v0 }
 0x11e   : > { %984 = vmax.xlane.f32.xlu0 %v983_v38  ;;  %2350 = vmatpush3.msra.mxu1 %v324_v37 }
 0x11f   : > { %2361 = vmatprep.subr.mxu1 %v2732_v0 }
 0x120   : > { %v580_v39 = vpop.f32.mrf.mxu0  ;;  %v659_v40 = vpop.f32.mrf.mxu1 }
 0x121   : > { %v986_v41 = vsel %vm979_vm2, %v580_v39, -inf  ;;  %v989_v44 = vsel %vm979_vm2, %v659_v40, -inf }
 0x122   : > { %v2311_v42 = vpop.f32.mrf.mxu1  ;;  %987 = vmax.xlane.f32.xlu1 %v986_v41  ;;  %v2304_v43 = vpop.f32.mrf.mxu0 }
 0x126   : > { %990 = vmax.xlane.f32.xlu1 %v989_v44  ;;  %v327_v44 = vld [vmem:[#allocation7 + $0x28] sm:$0xff] }
 0x128   : > { %v738_v45 = vpop.f32.mrf.mxu0  ;;  %v817_v46 = vpop.f32.mrf.mxu1 }
 0x129   : > { %v995_v47 = vsel %vm979_vm2, %v817_v46, -inf  ;;  %v992_v48 = vsel %vm979_vm2, %v738_v45, -inf }
 0x12a   : > { %v2325_v49 = vpop.f32.mrf.mxu1  ;;  %996 = vmax.xlane.f32.xlu1 %v995_v47  ;;  %993 = vmax.xlane.f32.xlu0 %v992_v48  ;;  %v2318_v50 = vpop.f32.mrf.mxu0  ;;  %v326_v47 = vld [vmem:[#allocation7 + $0x20] sm:$0xff] }
 0x12b   : > { %v329_v50 = vld [vmem:[#allocation7 + $0x38] sm:$0xff] }
 0x130   : > { %v896_v51 = vpop.f32.mrf.mxu0  ;;  %v975_v52 = vpop.f32.mrf.mxu1 }
 0x131   : > { %v1001_v53 = vsel %vm979_vm2, %v975_v52, -inf  ;;  %v998_v54 = vsel %vm979_vm2, %v896_v51, -inf }
 0x132   : > { %v2339_v55 = vpop.f32.mrf.mxu1  ;;  %1002 = vmax.xlane.f32.xlu1 %v1001_v53  ;;  %999 = vmax.xlane.f32.xlu0 %v998_v54  ;;  %v2332_v56 = vpop.f32.mrf.mxu0  ;;  %v331_v54 = vld [vmem:[#allocation7 + $0x48] sm:$0xff] }
 0x1a3   : > { %v982_v57 = vpop.xlane.xlu0 %981 }
 0x1a4   : > { %v1004_v58 = vsub.f32 %v422_v33, %v982_v57  ;;  %v330_v57 = vld [vmem:[#allocation7 + $0x40] sm:$0xff] }
 0x1a6   : > { %v1012_v59 = vmul.f32 1.442695, %v1004_v58 }
 0x1a7   : > { %v985_v60 = vpop.xlane.xlu0 %984 }
 0x1a8   : > { %2498 = vpow2.f32 %v1012_v59  ;;  %v1005_v61 = vsub.f32 %v501_v34, %v985_v60  ;;  %v333_v60 = vld [vmem:[#allocation7 + $0x58] sm:$0xff] }
 0x1aa   : > { %v1014_v62 = vmul.f32 1.442695, %v1005_v61  ;;  %v332_v61 = vld [vmem:[#allocation7 + $0x50] sm:$0xff] }
 0x1ab   : > { %v988_v63 = vpop.xlane.xlu1 %987 }
 0x1ac   : > { %2500 = vpow2.f32 %v1014_v62  ;;  %v1006_v1 = vsub.f32 %v580_v39, %v988_v63  ;;  %v2734_v63 = vmov 1983009808  }
 0x1ae   : > { %v1016_v2 = vmul.f32 1.442695, %v1006_v1  ;;  %v1079_v1 = vunpack.c.l.s4 %v2734_v63 }
 0x1af   : > { %v991_v3 = vpop.xlane.xlu1 %990 }
 0x1b0   : > { %2502 = vpow2.f32 %v1016_v2  ;;  %v1007_v4 = vsub.f32 %v659_v40, %v991_v3  ;;  %v1081_v2 = vlaneseq }
 0x1b2   : > { %v1018_v5 = vmul.f32 1.442695, %v1007_v4 }
 0x1b3   : > { %v997_v6 = vpop.xlane.xlu1 %996  ;;  %v994_v7 = vpop.xlane.xlu0 %993 }
 0x1b4   : > { %2504 = vpow2.f32 %v1018_v5  ;;  %v1009_v8 = vsub.f32 %v817_v46, %v997_v6  ;;  %v1008_v9 = vsub.f32 %v738_v45, %v994_v7  ;;  %v337_v5 = vld [vmem:[#allocation7 + $0x78] sm:$0xff]  ;;  %v335_v7 = vld [vmem:[#allocation7 + $0x68] sm:$0xff] }
 0x1b5   : > { %v2499_v10 = vpop.eup %2498 }
 0x1b6   : > { %v1022_v11 = vmul.f32 1.442695, %v1009_v8  ;;  %v1020_v12 = vmul.f32 1.442695, %v1008_v9  ;;  %v1028_v13 = vsel %vm979_vm2, %v2499_v10, 0.0  ;;  %v336_v8 = vld [vmem:[#allocation7 + $0x70] sm:$0xff] }
 0x1b7   : > { %1029 = vadd.xlane.f32.xlu0 %v1028_v13  ;;  %v334_v9 = vld [vmem:[#allocation7 + $0x60] sm:$0xff] }
 0x1b8   : > { %2506 = vpow2.f32 %v1022_v11  ;;  %v1082_v11 = vshrl.u32 %v1081_v2, 7 }
 0x1b9   : > { %v2501_v14 = vpop.eup %2500  ;;  %2508 = vpow2.f32 %v1020_v12  ;;  %v2735_v12 = vmov 1934713408  }
 0x1ba   : > { %v1031_v15 = vsel %vm979_vm2, %v2501_v14, 0.0  ;;  %v1143_v13 = vunpack.c.l.s4 %v2735_v12 }
 0x1bb   : > { %1032 = vadd.xlane.f32.xlu1 %v1031_v15  ;;  %v1003_v16 = vpop.xlane.xlu1 %1002  ;;  %v1000_v17 = vpop.xlane.xlu0 %999 }
 0x1bc   : > { %v1011_v18 = vsub.f32 %v975_v52, %v1003_v16  ;;  %v1010_v19 = vsub.f32 %v896_v51, %v1000_v17  ;;  %v328_v51 = vld [vmem:[#allocation7 + $0x30] sm:$0xff] }
 0x1bd   : > { %v2992_v20 = vpop.eup %2502 }
 0x1be   : > { %v1026_v21 = vmul.f32 1.442695, %v1011_v18  ;;  %v1024_v22 = vmul.f32 1.442695, %v1010_v19  ;;  %v1034_v23 = vsel %vm979_vm2, %v2992_v20, 0.0 }
 0x1bf   : > { %1035 = vadd.xlane.f32.xlu0 %v1034_v23 }
 0x1c0   : > { %2510 = vpow2.f32 %v1026_v21 }
 0x1c1   : > { %v2996_v24 = vpop.eup %2504  ;;  %2512 = vpow2.f32 %v1024_v22 }
 0x1c2   : > { %v1037_v25 = vsel %vm979_vm2, %v2996_v24, 0.0 }
 0x1c3   : > { %1038 = vadd.xlane.f32.xlu1 %v1037_v25 }
 0x1c5   : > { %v3000_v26 = vpop.eup %2506 }
 0x1c6   : > { %v3002_v27 = vpop.eup %2508  ;;  %v1043_v28 = vsel %vm979_vm2, %v3000_v26, 0.0 }
 0x1c7   : > { %1044 = vadd.xlane.f32.xlu1 %v1043_v28  ;;  %v1040_v29 = vsel %vm979_vm2, %v3002_v27, 0.0 }
 0x1c8   : > { %1041 = vadd.xlane.f32.xlu0 %v1040_v29 }
 0x1cd   : > { %v3008_v30 = vpop.eup %2510 }
 0x1ce   : > { %v3010_v33 = vpop.eup %2512  ;;  %v1049_v34 = vsel %vm979_vm2, %v3008_v30, 0.0 }
 0x1cf   : > { %1050 = vadd.xlane.f32.xlu1 %v1049_v34  ;;  %v1046_v35 = vsel %vm979_vm2, %v3010_v33, 0.0 }
 0x1d0   : > { %1047 = vadd.xlane.f32.xlu0 %v1046_v35 }
 0x240   : > { %v1030_v38 = vpop.xlane.xlu0 %1029 }
 0x241   : > { %2514 = vrcp.f32 %v1030_v38 }
 0x244   : > { %v1033_v39 = vpop.xlane.xlu1 %1032 }
 0x245   : > { %2516 = vrcp.f32 %v1033_v39 }
 0x248   : > { %v1036_v40 = vpop.xlane.xlu0 %1035 }
 0x249   : > { %2518 = vrcp.f32 %v1036_v40 }
 0x24c   : > { %v1039_v41 = vpop.xlane.xlu1 %1038 }
 0x24d   : > { %2520 = vrcp.f32 %v1039_v41 }
 0x24e   : > { %v2515_v42 = vpop.eup %2514 }
 0x24f   : > { %v3020_v43 = vmul.f32 %v2515_v42, %v2499_v10  ;;  %v1080_v10 = vunpack.c.0.s8 %v1079_v1 }
 0x250   : > { %v1045_v45 = vpop.xlane.xlu1 %1044 }
 0x251   : > { %2522 = vrcp.f32 %v1045_v45  ;;  %v1042_v46 = vpop.xlane.xlu0 %1041  ;;  %2345 = vmatmul.mubr.msk.f32.vlgmr.msra.gmra.mxu0 %vm979_vm2, %v3020_v43  ;;  %v3064_v17 = vsub.s32 %v1080_v10, %v1082_v11 }
 0x252   : > { %v2517_v48 = vpop.eup %2516  ;;  %2524 = vrcp.f32 %v1042_v46  ;;  %2355 = vmatpush3.msra.mxu0 %v327_v44  ;;  %2358 = vmatprep.mubr.msk.f32.mxu0 %vm2733_vm0, %v2732_v0 }
 0x253   : > { %v3026_v49 = vmul.f32 %v2517_v48, %v2501_v14  ;;  %2356 = vmatprep.subr.mxu0 %v2732_v0 }
 0x254   : > { %2357 = vmatpush3.msra.mxu0 %v326_v47 }
 0x255   : > { %2352 = vmatmul.mubr.msk.f32.vlgmr.msra.gmra.mxu1 %vm979_vm2, %v3026_v49  ;;  %2368 = vmatprep.subr.mxu0 %v2732_v0 }
 0x256   : > { %v2519_v52 = vpop.eup %2518  ;;  %2362 = vmatpush3.msra.mxu1 %v329_v50  ;;  %2365 = vmatprep.mubr.msk.f32.mxu1 %vm2733_vm0, %v2732_v0 }
 0x257   : > { %v3035_v53 = vmul.f32 %v2519_v52, %v2992_v20  ;;  %2363 = vmatprep.subr.mxu1 %v2732_v0  ;;  %v1144_v20 = vunpack.c.0.s8 %v1143_v13 }
 0x258   : > { %v1051_v55 = vpop.xlane.xlu1 %1050  ;;  %2364 = vmatpush3.msra.mxu1 %v328_v51 }
 0x259   : > { %2526 = vrcp.f32 %v1051_v55  ;;  %v1048_v56 = vpop.xlane.xlu0 %1047  ;;  %2359 = vmatmul.mubr.msk.f32.vlgmr.msra.gmra.mxu0 %vm979_vm2, %v3035_v53  ;;  %2375 = vmatprep.subr.mxu1 %v2732_v0  ;;  %v1076_v16 = vcombine.low %v3020_v43, %v3035_v53 }
 0x25a   : > { %v2521_v58 = vpop.eup %2520  ;;  %2528 = vrcp.f32 %v1048_v56  ;;  %2369 = vmatpush3.msra.mxu0 %v331_v54  ;;  %2372 = vmatprep.mubr.msk.f32.mxu0 %vm2733_vm0, %v2732_v0 }
 0x25b   : > { %v1071_v59 = vmul.f32 %v2521_v58, %v2996_v24  ;;  %2370 = vmatprep.subr.mxu0 %v2732_v0 }
 0x25c   : > { %2371 = vmatpush3.msra.mxu0 %v330_v57 }
 0x25d   : > { %2366 = vmatmul.mubr.msk.f32.vlgmr.msra.gmra.mxu1 %vm979_vm2, %v1071_v59  ;;  %2382 = vmatprep.subr.mxu0 %v2732_v0  ;;  %v1092_v14 = vcombine.low %v3026_v49, %v1071_v59  ;;  %v1093_v21 = vcombine.high %v3026_v49, %v1071_v59 }
 0x25e   : > { %v2523_v62 = vpop.eup %2522  ;;  %2376 = vmatpush3.msra.mxu1 %v333_v60  ;;  %2379 = vmatprep.mubr.msk.f32.mxu1 %vm2733_vm0, %v2732_v0 }
 0x25f   : > { %v2525_v3 = vpop.eup %2524  ;;  %2377 = vmatprep.subr.mxu1 %v2732_v0  ;;  %v1073_v4 = vmul.f32 %v2523_v62, %v3000_v26  ;;  %v1100_v23 = vrot.slane %v1092_v14, %v3064_v17  ;;  %v1084_v26 = vrot.slane %v1076_v16, %v3064_v17  ;;  %v1107_v31 = vrot.slane %v1093_v21, %v3064_v17 }
 0x260   : > { %2378 = vmatpush3.msra.mxu1 %v332_v61  ;;  %v1072_v6 = vmul.f32 %v2525_v3, %v3002_v27 }
 0x261   : > { %2380 = vmatmul.mubr.msk.f32.vlgmr.msra.gmra.mxu1 %vm979_vm2, %v1073_v4  ;;  %2389 = vmatprep.subr.mxu1 %v2732_v0  ;;  %v1141_v34 = vcombine.high %v1084_v26, %v1100_v23  ;;  %v1140_v35 = vcombine.low %v1084_v26, %v1100_v23 }
 0x262   : > { %2373 = vmatmul.mubr.msk.f32.vlgmr.msra.gmra.mxu0 %vm979_vm2, %v1072_v6  ;;  %2390 = vmatpush3.msra.mxu1 %v337_v5 }
 0x263   : > { %2383 = vmatpush3.msra.mxu0 %v335_v7  ;;  %2391 = vmatprep.subr.mxu1 %v2732_v0 }
 0x264   : > { %2384 = vmatprep.subr.mxu0 %v2732_v0  ;;  %2392 = vmatpush3.msra.mxu1 %v336_v8 }
 0x265   : > { %2385 = vmatpush3.msra.mxu0 %v334_v9  ;;  %2386 = vmatprep.mubr.msk.f32.mxu0 %vm2733_vm0, %v2732_v0 }
 0x266   : > { %v2527_v15 = vpop.eup %2526  ;;  %2393 = vmatprep.mubr.msk.f32.mxu1 %vm2733_vm0, %v2732_v0  ;;  %v1077_v0 = vcombine.high %v3020_v43, %v3035_v53 }
 0x267   : > { %v2529_v18 = vpop.eup %2528  ;;  %v1075_v19 = vmul.f32 %v2527_v15, %v3008_v30  ;;  %v3076_v30 = vsub.s32 %v1144_v20, %v1082_v11 }
 0x268   : > { %v1074_v22 = vmul.f32 %v2529_v18, %v3010_v33  ;;  %v1091_v37 = vrot.slane %v1077_v0, %v3064_v17 }
 0x269   : > { %2394 = vmatmul.mubr.msk.f32.vlgmr.msra.gmra.mxu1 %vm979_vm2, %v1075_v19  ;;  %v1124_v24 = vcombine.low %v1073_v4, %v1075_v19  ;;  %v1125_v25 = vcombine.high %v1073_v4, %v1075_v19  ;;  %v1155_v42 = vrot.slane %v1141_v34, %v3076_v30  ;;  %v1148_v44 = vrot.slane %v1140_v35, %v3076_v30 }
 0x26a   : > { %2387 = vmatmul.mubr.msk.f32.vlgmr.msra.gmra.mxu0 %vm979_vm2, %v1074_v22  ;;  %v1108_v27 = vcombine.low %v1072_v6, %v1074_v22  ;;  %v1109_v28 = vcombine.high %v1072_v6, %v1074_v22  ;;  %v1156_v41 = vcombine.low %v1091_v37, %v1107_v31  ;;  %v1157_v52 = vcombine.high %v1091_v37, %v1107_v31 }
 0x26b   : > { %v1132_v29 = vrot.slane %v1124_v24, %v3064_v17  ;;  %v1139_v32 = vrot.slane %v1125_v25, %v3064_v17 }
 0x26c   : > { %v1116_v33 = vrot.slane %v1108_v27, %v3064_v17  ;;  %v1123_v36 = vrot.slane %v1109_v28, %v3064_v17  ;;  %v1164_v51 = vrot.slane %v1156_v41, %v3076_v30  ;;  %v1171_v56 = vrot.slane %v1157_v52, %v3076_v30 }
 0x26e   : > { %v1173_v38 = vcombine.high %v1116_v33, %v1132_v29  ;;  %v1172_v39 = vcombine.low %v1116_v33, %v1132_v29  ;;  %v1188_v40 = vcombine.low %v1123_v36, %v1139_v32  ;;  %v1189_v49 = vcombine.high %v1123_v36, %v1139_v32 }
 0x270   : > { %v1187_v43 = vrot.slane %v1173_v38, %v3076_v30  ;;  %v1180_v45 = vrot.slane %v1172_v39, %v3076_v30  ;;  %v1196_v48 = vrot.slane %v1188_v40, %v3076_v30  ;;  %v1203_v55 = vrot.slane %v1189_v49, %v3076_v30 }
 0x272   : > { %v1206_v46 = vcombine.low %v1155_v42, %v1187_v43  ;;  %v1205_v47 = vcombine.high %v1148_v44, %v1180_v45  ;;  %v1204_v50 = vcombine.low %v1148_v44, %v1180_v45  ;;  %v1207_v53 = vcombine.high %v1155_v42, %v1187_v43 }
 0x273   : > { %v1209_v54 = vcombine.high %v1164_v51, %v1196_v48  ;;  %v1208_v57 = vcombine.low %v1164_v51, %v1196_v48  ;;  %v1211_v58 = vcombine.high %v1171_v56, %v1203_v55  ;;  %v1210_v59 = vcombine.low %v1171_v56, %v1203_v55 }
 0x274   : > { %1217 = vrot.lane.b32.xlu1 %v1206_v46, %s2736_s23  ;;  %1213 = vrot.lane.b32.xlu0 %v1205_v47, %s2737_s25  ;;  %s2614_s25 = sshll.u32 %s2743_s11, 4  ;;  %s2615_s25 = int_to_ptr.vmem [resolvable:$false] %s2614_s25 }
 0x275   : > { %p2617_p11 = scmp.lt.s32.totalorder %s2043_s30, %s2615_s25 }
 0x278   : > { %1221 = vrot.lane.b32.xlu1 %v1207_v53, %s2738_s28  ;;  %1229 = vrot.lane.b32.xlu0 %v1209_v54, %s2739_s6  ;;  %s2616_s28 = scalar_lea.vmem %s2615_s25, 256 }
 0x279   : > { %p2618_p5 = scmp.lt.s32.totalorder %s2616_s28, %s2610_s2 }
 0x27b   : > { %p2619_p13 = por %p2618_p5, %p2617_p11 }
 0x27c   : > { %1225 = vrot.lane.b32.xlu1 %v1208_v57, %s2740_s10  ;;  %1237 = vrot.lane.b32.xlu0 %v1211_v58, %s2741_s12 }
 0x27d   : > { %p2620_p4 = pnand %p2619_p13, %p2613_p7 }
 0x280   : > { %1233 = vrot.lane.b32.xlu1 %v1210_v59, %s2742_s13 }
 0x2e6   : > { %v1218_v60 = vpop.permute.xlu1 %1217  ;;  %v1214_v61 = vpop.permute.xlu0 %1213 }
 0x2e7   : > { %v1240_v62 = vsel %vm979_vm2, %v1204_v50, %v1214_v61 }
 0x2e8   : > { %v1241_v1 = vsel %vm346_vm1, %v1240_v62, %v1218_v60 }
 0x2ea   : > { %v1222_v63 = vpop.permute.xlu1 %1221  ;;  %v1230_v2 = vpop.permute.xlu0 %1229 }
 0x2eb   : > { %v1243_v3 = vsel %vm1242_vm3, %v1241_v1, %v1222_v63 }
 0x2ee   : > { %v1226_v4 = vpop.permute.xlu1 %1225  ;;  %v1238_v8 = vpop.permute.xlu0 %1237 }
 0x2ef   : > { %v1245_v5 = vsel %vm1244_vm4, %v1243_v3, %v1226_v4 }
 0x2f0   : > { %v1247_v7 = vsel %vm1246_vm5, %v1245_v5, %v1230_v2 }
 0x2f2   : > { %v1234_v6 = vpop.permute.xlu1 %1233 }
 0x2f3   : > { %v1249_v9 = vsel %vm1248_vm6, %v1247_v7, %v1234_v6 }
 0x2f4   : > { %v1251_v10 = vsel %vm1250_vm7, %v1249_v9, %v1238_v8 }
 0x2f5   : > { %1252 = vst [vmem:[%s3099_s21] sm:$0xff] %v1251_v10 }
 0x311   : > { %v1322_v11 = vpop.f32.mrf.mxu0 }
 0x313   : > { %v2346_v12 = vpop.f32.mrf.mxu0 }
 0x315   : > { %v1395_v13 = vpop.f32.mrf.mxu1 }
 0x317   : > { %v2353_v14 = vpop.f32.mrf.mxu1 }
 0x319   : > { %v1468_v15 = vpop.f32.mrf.mxu0 }
 0x31a   : > { %v1837_v25 = vcombine.low %v1322_v11, %v1468_v15  ;;  %v1838_v26 = vcombine.high %v1322_v11, %v1468_v15 }
 0x31b   : > { %v2360_v16 = vpop.f32.mrf.mxu0 }
 0x31c   : > { %v1845_v34 = vrot.slane %v1837_v25, %v3064_v17  ;;  %v1852_v35 = vrot.slane %v1838_v26, %v3064_v17 }
 0x31d   : > { %v1541_v18 = vpop.f32.mrf.mxu1 }
 0x31e   : > { %v1853_v24 = vcombine.low %v1395_v13, %v1541_v18  ;;  %v1854_v0 = vcombine.high %v1395_v13, %v1541_v18 }
 0x31f   : > { %v2367_v19 = vpop.f32.mrf.mxu1 }
 0x320   : > { %v1861_v27 = vrot.slane %v1853_v24, %v3064_v17  ;;  %v1868_v28 = vrot.slane %v1854_v0, %v3064_v17 }
 0x321   : > { %v1687_v20 = vpop.f32.mrf.mxu1 }
 0x322   : > { %v1614_v21 = vpop.f32.mrf.mxu0  ;;  %v1901_v42 = vcombine.low %v1845_v34, %v1861_v27  ;;  %v1917_v43 = vcombine.low %v1852_v35, %v1868_v28  ;;  %v1902_v50 = vcombine.high %v1845_v34, %v1861_v27  ;;  %v1918_v51 = vcombine.high %v1852_v35, %v1868_v28 }
 0x323   : > { %v2381_v22 = vpop.f32.mrf.mxu1 }
 0x324   : > { %v2374_v23 = vpop.f32.mrf.mxu0  ;;  %v1925_v52 = vrot.slane %v1917_v43, %v3076_v30  ;;  %v1909_v54 = vrot.slane %v1901_v42, %v3076_v30  ;;  %v1916_v61 = vrot.slane %v1902_v50, %v3076_v30  ;;  %v1932_v62 = vrot.slane %v1918_v51, %v3076_v30 }
 0x329   : > { %v1833_v29 = vpop.f32.mrf.mxu1 }
 0x32a   : > { %v1760_v31 = vpop.f32.mrf.mxu0  ;;  %v1885_v32 = vcombine.low %v1687_v20, %v1833_v29  ;;  %v1886_v33 = vcombine.high %v1687_v20, %v1833_v29 }
 0x32b   : > { %v1869_v36 = vcombine.low %v1614_v21, %v1760_v31  ;;  %v1870_v37 = vcombine.high %v1614_v21, %v1760_v31  ;;  %v2395_v38 = vpop.f32.mrf.mxu1 }
 0x32c   : > { %v1893_v39 = vrot.slane %v1885_v32, %v3064_v17  ;;  %v1900_v40 = vrot.slane %v1886_v33, %v3064_v17  ;;  %v2388_v41 = vpop.f32.mrf.mxu0 }
 0x32d   : > { %v1877_v44 = vrot.slane %v1869_v36, %v3064_v17  ;;  %v1884_v45 = vrot.slane %v1870_v37, %v3064_v17 }
 0x32f   : > { %v1933_v46 = vcombine.low %v1877_v44, %v1893_v39  ;;  %v1934_v47 = vcombine.high %v1877_v44, %v1893_v39  ;;  %v1949_v48 = vcombine.low %v1884_v45, %v1900_v40  ;;  %v1950_v49 = vcombine.high %v1884_v45, %v1900_v40 }
 0x331   : > { %v1957_v53 = vrot.slane %v1949_v48, %v3076_v30  ;;  %v1941_v55 = vrot.slane %v1933_v46, %v3076_v30  ;;  %v1948_v17 = vrot.slane %v1934_v47, %v3076_v30  ;;  %v1964_v58 = vrot.slane %v1950_v49, %v3076_v30 }
 0x333   : > { %v1970_v56 = vcombine.high %v1925_v52, %v1957_v53  ;;  %v1966_v57 = vcombine.high %v1909_v54, %v1941_v55  ;;  %v1969_v59 = vcombine.low %v1925_v52, %v1957_v53  ;;  %v1965_v60 = vcombine.low %v1909_v54, %v1941_v55 }
 0x335   : > { %1986 = vrot.lane.b32.xlu0 %v1970_v56, %s2736_s23  ;;  %1974 = vrot.lane.b32.xlu1 %v1966_v57, %s2736_s23 }
 0x336   : > { %2623 = shalt.err (!%p2620_p4)
}
 0x337   : > { %s2624_s23 = scalar_lea.hbm %s3120_s24, 128  ;;  %s2628_s14 = scalar_lea.hbm %s3211_s4, 256 }
 0x338   : > { %p2625_p1 = scmp.ne.s32.totalorder %s3120_s24, %s2624_s23  ;;  %p2629_p3 = scmp.lt.s32.totalorder %s3120_s24, %s3211_s4 }
 0x339   : > { %p2630_p0 = scmp.lt.s32.totalorder %s2628_s14, %s2624_s23 }
 0x33a   : > { %p2626_p10 = pnand %p2625_p1, %p3232_p12 }
 0x33b   : > { %p2631_p2 = por %p2630_p0, %p2629_p3 }
 0x33c   : > { %p2627_p8 = pneg %p2626_p10 }
 0x33e   : > { %p2632_p6 = pnand %p2631_p2, %p2627_p8 }
 0x340   : > { %2635 = shalt.err (!%p2632_p6)
}
 0x341   : > { %2407 = dma.vmem_to_hbm [thread:$0]  (%p3232_p12), %s2043_s30, 128, %s3120_s24, %s2011_s1   ;;  %v1967_v30 = vcombine.low %v1916_v61, %v1948_v17  ;;  %v1971_v63 = vcombine.low %v1932_v62, %v1964_v58  ;;  %v1972_v1 = vcombine.high %v1932_v62, %v1964_v58  ;;  %v1968_v2 = vcombine.high %v1916_v61, %v1948_v17 }
 0x342   : > { %s2194_s9 = sshll.u32 %s2898_s5, 4  ;;  %s2235_s30 = sshll.u32 %s2716_s18, 8 }
 0x343   : > { %1978 = vrot.lane.b32.xlu0 %v1967_v30, %s2740_s10  ;;  %1990 = vrot.lane.b32.xlu1 %v1971_v63, %s2740_s10  ;;  %s286_s7 = scalar_lea.vmem [#allocation8], %s2194_s9  ;;  %s3157_s1 = scalar_lea.hbm %s3210_s3, %s2235_s30 }
 0x344   : > { %s2027_s24 = sshll.u32 %s286_s7, 4  ;;  %s2006_s18 = scalar_lea.sflag [#allocation4], %s2898_s5  ;;  %s3159_s24 = int_to_ptr.vmem [resolvable:$true] %s2027_s24 }
 0x345   : > { %s2636_s2 = scalar_lea.vmem %s3159_s24, 256  ;;  %s2744_s11 = smov [#allocation8]  }
 0x346   : > { %p2637_p9 = scmp.ne.s32.totalorder %s3159_s24, %s2636_s2  ;;  %s2640_s25 = sshll.u32 %s2744_s11, 4  ;;  %s2641_s25 = int_to_ptr.vmem [resolvable:$false] %s2640_s25 }
 0x347   : > { %1994 = vrot.lane.b32.xlu0 %v1972_v1, %s2742_s13  ;;  %1982 = vrot.lane.b32.xlu1 %v1968_v2, %s2742_s13  ;;  %s2642_s28 = scalar_lea.vmem %s2641_s25, 512  ;;  %p2643_p5 = scmp.lt.s32.totalorder %s3159_s24, %s2641_s25 }
 0x348   : > { %p2638_p7 = pnand %p2637_p9, %p3232_p12  ;;  %p2644_p13 = scmp.lt.s32.totalorder %s2642_s28, %s2636_s2 }
 0x34a   : > { %p2639_p11 = pneg %p2638_p7  ;;  %p2645_p4 = por %p2644_p13, %p2643_p5 }
 0x34c   : > { %p2646_p1 = pnand %p2645_p4, %p2639_p11 }
 0x3a7   : > { %v1987_v3 = vpop.permute.xlu0 %1986  ;;  %v1975_v4 = vpop.permute.xlu1 %1974 }
 0x3a8   : > { %v2000_v7 = vsel %vm346_vm1, %v1969_v59, %v1987_v3  ;;  %v1997_v8 = vsel %vm346_vm1, %v1965_v60, %v1975_v4 }
 0x3b5   : > { %v1979_v5 = vpop.permute.xlu0 %1978  ;;  %v1991_v6 = vpop.permute.xlu1 %1990 }
 0x3b6   : > { %v1998_v9 = vsel %vm1244_vm4, %v1997_v8, %v1979_v5  ;;  %v2001_v10 = vsel %vm1244_vm4, %v2000_v7, %v1991_v6 }
 0x3b9   : > { %v1995_v11 = vpop.permute.xlu0 %1994  ;;  %v1983_v12 = vpop.permute.xlu1 %1982 }
 0x3ba   : > { %v2002_v13 = vsel %vm1248_vm6, %v2001_v10, %v1995_v11  ;;  %v1999_v14 = vsel %vm1248_vm6, %v1998_v9, %v1983_v12 }
 0x3bb   : > { %2004 = vst [vmem:[%s286_s7 + $0x8] sm:$0xff] %v2002_v13  ;;  %2003 = vst [vmem:[%s286_s7] sm:$0xff] %v1999_v14 }
 0x3bc   : > { %2649 = shalt.err (!%p2646_p1)
}
 0x3bd   : > { %s2650_s23 = scalar_lea.hbm %s3157_s1, 256  ;;  %s2654_s12 = scalar_lea.hbm %s3210_s3, 512 }
 0x3be   : > { %p2651_p10 = scmp.ne.s32.totalorder %s3157_s1, %s2650_s23  ;;  %p2655_p0 = scmp.lt.s32.totalorder %s3157_s1, %s3210_s3 }
 0x3bf   : > { %p2656_p2 = scmp.lt.s32.totalorder %s2654_s12, %s2650_s23 }
 0x3c0   : > { %p2652_p8 = pnand %p2651_p10, %p3232_p12 }
 0x3c1   : > { %p2657_p6 = por %p2656_p2, %p2655_p0 }
 0x3c2   : > { %p2653_p3 = pneg %p2652_p8 }
 0x3c4   : > { %p2658_p9 = pnand %p2657_p6, %p2653_p3 }
 0x3c6   : > { %2661 = shalt.err (!%p2658_p9)
}
 0x3c7   : > { %2406 = dma.vmem_to_hbm [thread:$0]  (%p3232_p12), %s3159_s24, 256, %s3157_s1, %s2006_s18  }
 0x3c8 PF: > { %s2054_s22 = sand.u32 1, %s2704_s15   ;;  %p3233_p7 = scmp.ne.s32.totalorder %s3223_s27, 0 }
 0x3c9   : > { %p3234_p11 = scmp.ge.s32.totalorder %s2724_s20, 2  ;;  %s2055_s9 = scalar_lea.sflag [#allocation4], %s2054_s22 }
 0x3cb   : > { %p2422_p5 = pnand %p3234_p11, %p3233_p7 }
 0x3cd   : > { %p2423_p13 = pneg %p2422_p5 }
 0x3cf   : > { %2695 = dma.done.wait (%p2423_p13), %s2055_s9, 256  }
 0x3d0   : > { %2697 = vsyncadd (%p2423_p13), %s2055_s9, 4294967040  ;;  %s2064_s7 = scalar_lea.sflag [#allocation10], %s2054_s22 }
 0x3d1   : > { %2699 = dma.done.wait (%p2423_p13), %s2064_s7, 128  }
 0x3d2   : > { %2701 = vsyncadd (%p2423_p13), %s2064_s7, 4294967168  ;;  %s25_s20 = sadd.s32 1, %s2724_s20   ;;  %s3235_s15 = smov %s2708_s16 }
 0x3d3   : > { %p22_p4 = scmp.ge.s32.totalorder %s25_s20, 4   ;;  %s3236_s16 = smov %s2712_s17 }
 0x3d4   : > { %s3237_s17 = smov %s2887_s8  ;;  %s3238_s18 = smov %s2720_s19 }
 0x3d5   : > { %s3239_s19 = smov %s3241_s29  ;;  %24 = sbr.rel (!%p22_p4) target bundleno = 12 (0xc), region = 104 }
 0x3da   :  { %2069 = vsyncpa [#allocation3], 1 }
 0x3db   :  { %2071 = vsyncpa [#allocation3 + $0x1], 1 }
 0x3dc   :  { %2072 = vsyncpa [#allocation6], 1 }
 0x3dd   :  { %2073 = vsyncpa [#allocation4], 1 }
 0x3de   :  { %2075 = vsyncpa [#allocation4 + $0x1], 1 }
 0x3df   :  { %2076 = vsyncpa [#allocation10], 1 }
 0x3e0   :  { %2078 = vsyncpa [#allocation10 + $0x1], 1 }

// kernel: tpu_custom_call.1
= control target key start
LH: loop header
LB: loop body
LE: loop exit
PB: predicated region body
PF: predicated region fallthrough
CT: control target
= control target key end

     0   :  { %s2846_s0 = inlined_call_operand.hbm [shape: f32[8,16,32], index: 0, kind: input, shape index: {}]   ;;  %s2847_s1 = inlined_call_operand.hbm [shape: f32[8,16,32], index: 1, kind: input, shape index: {}]   ;;  %s2848_s2 = inlined_call_operand.hbm [shape: f32[8,16,32], index: 2, kind: input, shape index: {}]   ;;  %s2849_s3 = inlined_call_operand.hbm [shape: f32[8,16,32], index: 3, kind: output, shape index: {0}]   ;;  %s2850_s4 = inlined_call_operand.hbm [shape: f32[8,16,16], index: 4, kind: output, shape index: {1}]  }
   0x1   :  { %2856 = sst [smem:[#allocation15_spill]] %s2847_s1 }
   0x2   :  { %2857 = sst [smem:[#allocation16_spill]] %s2848_s2 }
   0x3   :  { %10 = vsyncpa [#allocation3], 0 }
   0x4   :  { %12 = vsyncpa [#allocation3 + $0x1], 0 }
   0x5   :  { %13 = vsyncpa [#allocation6], 0 }
   0x6   :  { %14 = vsyncpa [#allocation4], 0 }
   0x7   :  { %16 = vsyncpa [#allocation4 + $0x1], 0 }
   0x8   :  { %17 = vsyncpa [#allocation10], 0 }
   0x9   :  { %19 = vsyncpa [#allocation10 + $0x1], 0  ;;  %s2432_s15 = smov 0   ;;  %s2434_s16 = smov 0  }
   0xa   :  { %s2436_s17 = smov 0   ;;  %s2438_s18 = smov 0  }
   0xb   :  { %s2440_s19 = smov 0   ;;  %s2442_s20 = smov 0  }
   0xc LB: > { %s1858_s21 = sadd.s32 4294967295, %s2392_s20   ;;  %s1859_s22 = sadd.s32 4294967294, %s2392_s20   ;;  %s2392_s20 = sphi %s2442_s20, %s25_s20   ;;  %s2388_s19 = sphi %s2440_s19, %s2878_s19   ;;  %s2384_s18 = sphi %s2438_s18, %s2877_s18   ;;  %s2380_s17 = sphi %s2436_s17, %s2876_s17   ;;  %s2376_s16 = sphi %s2434_s16, %s2875_s16   ;;  %s2372_s15 = sphi %s2432_s15, %s2874_s15  }
   0xd   : > { %p53_p0 = scmp.ne.s32.totalorder %s2380_s17, %s2376_s16  ;;  %p54_p1 = scmp.eq.s32.totalorder %s2392_s20, 0 }
   0xe   : > { %p59_p2 = scmp.ne.s32.totalorder %s2376_s16, %s2372_s15  ;;  %p2469_p3 = scmp.eq.s32.totalorder %s1858_s21, 0 }
   0xf   : > { %p2473_p4 = por %p54_p1, %p53_p0  ;;  %p137_p5 = scmp.eq.s32.totalorder %s1858_s21, 1 }
  0x10   : > { %s2858_s23 = scalar_select %p2469_p3, 1, 0 }
  0x11   : > { %p2479_p6 = por %p2469_p3, %p59_p2  ;;  %p143_p7 = scmp.eq.s32.totalorder %s1859_s22, 1 }
  0x12   : > { %p2483_p8 = por %p137_p5, %p53_p0  ;;  %p1860_p9 = scmp.ge.s32.totalorder %s2392_s20, 1 }
  0x13   : > { %p2488_p10 = por %p143_p7, %p59_p2  ;;  %p178_p11 = scmp.lt.s32.totalorder %s2392_s20, 3 }
  0x14   : > { %s2861_s26 = scalar_select %p2483_p8, 1, 0 }
  0x15   : > { %s2862_s27 = scalar_select %p2488_p10, 1, 0 }
  0x16   : > { %p2493_p12 = pnand %p1860_p9, %p178_p11  ;;  %s2394_s29 = smov [#allocation5]  }
  0x17   : > { %s194_s30 = sshll.u32 %s2394_s29, 4  ;;  %p2104_p1 = scmp.lt.s32.totalorder %s2392_s20, 2  ;;  %s195_s30 = int_to_ptr.vmem [resolvable:$true] %s194_s30 }
  0x18   : > { %p2084_p13 = pneg %p2493_p12  ;;  %s2395_s7 = smov [#allocation7]  }
  0x19   : > { %p2509_p2 = pnand %p2104_p1, %p2473_p4  ;;  %s211_s8 = sshll.u32 %s2395_s7, 4  ;;  %s212_s8 = int_to_ptr.vmem [resolvable:$true] %s211_s8 }
  0x1a   : > { %p2503_p5 = pnand %p2084_p13, %p2469_p3  ;;  %s2209_s9 = scalar_lea.vmem %s195_s30, 2048 }
  0x1b   : > { %p2210_p9 = scmp.ne.s32.totalorder %s195_s30, %s2209_s9  ;;  %p2217_p0 = scmp.lt.s32.totalorder %s195_s30, %s195_s30 }
  0x1c   : > { %p2200_p7 = pneg %p2503_p5  ;;  %p2218_p10 = scmp.lt.s32.totalorder %s2209_s9, %s2209_s9 }
  0x1e   : > { %p2212_p11 = pnand %p2210_p9, %p2200_p7  ;;  %p2219_p8 = por %p2218_p10, %p2217_p0 }
  0x20   : > { %p2213_p13 = pneg %p2212_p11 }
  0x22   : > { %p2220_p3 = pnand %p2219_p8, %p2213_p13 }
  0x24   : > { %2223 = shalt.err (!%p2220_p3)
}
  0x25   : > { %s2854_s10 = smov 128   ;;  %s2855_s11 = smov 8  }
  0x26   : > { %s2866_s1 = sld [smem:[#allocation15_spill]]  ;;  %s2235_s14 = scalar_lea.vmem %s212_s8, 2048 }
  0x27   : > { %p2236_p4 = scmp.ne.s32.totalorder %s212_s8, %s2235_s14  ;;  %p2243_p8 = scmp.lt.s32.totalorder %s212_s8, %s212_s8 }
  0x28   : > { %p2244_p3 = scmp.lt.s32.totalorder %s2235_s14, %s2235_s14 }
  0x29   : > { %p2238_p1 = pnand %p2236_p4, %p2200_p7 }
  0x2a   : > { %p2245_p0 = por %p2244_p3, %p2243_p8 }
  0x2b   : > { %p2239_p10 = pneg %p2238_p1 }
  0x2c   : > { %2087 = dma.hbm_to_vmem [thread:$0]  (!%p2503_p5), %s2866_s1, 2048, %s195_s30, [#allocation6], %s2854_s10, %s2854_s10, %s2855_s11  }
  0x2d   : > { %p2246_p9 = pnand %p2245_p0, %p2239_p10 }
  0x2f   : > { %2249 = shalt.err (!%p2246_p9)
}
  0x30   : > { %s2867_s2 = sld [smem:[#allocation16_spill]]  ;;  %s46_s24 = sadd.s32 1, %s2380_s17 }
  0x31   : > { %s34_s29 = sadd.s32 1, %s2388_s19  ;;  %s225_s30 = sand.u32 1, %s2380_s17  }
  0x32   : > { %p35_p7 = scmp.ge.s32.totalorder %s34_s29, 2  ;;  %s1864_s7 = sshll.u32 %s225_s30, 6 }
  0x33   : > { %s1865_s5 = sshll.u32 %s2388_s19, 7  ;;  %s229_s21 = scalar_lea.vmem [#allocation2], %s1864_s7 }
  0x34   : > { %s2880_s29 = smov (%p35_p7, %s34_s29), 0  ;;  %s237_s13 = scalar_lea.hbm %s2846_s0, %s1865_s5 }
  0x35   : > { %s42_s14 = ssub.s32 %s2388_s19, %s2880_s29  ;;  %s238_s22 = sshll.u32 %s229_s21, 4  ;;  %s239_s22 = int_to_ptr.vmem [resolvable:$true] %s238_s22 }
  0x36   : > { %2090 = dma.hbm_to_vmem [thread:$0]  (!%p2503_p5), %s2867_s2, 2048, %s212_s8, [#allocation6], %s2854_s10, %s2854_s10, %s2855_s11  }
  0x37   : > { %p44_p11 = scmp.eq.s32.totalorder %s42_s14, 0  ;;  %s226_s10 = scalar_lea.sflag [#allocation3], %s225_s30 }
  0x38   : > { %p2252_p5 = pneg %p2509_p2  ;;  %s2263_s11 = scalar_lea.vmem %s239_s22, 1024 }
  0x39   : > { %s2549_s8 = scalar_select %p44_p11, %s2380_s17, %s46_s24  }
  0x3a   : > { %p2264_p13 = scmp.ne.s32.totalorder %s239_s22, %s2263_s11  ;;  %s2398_s1 = smov [#allocation2]  }
  0x3b   : > { %s2268_s2 = sshll.u32 %s2398_s1, 4  ;;  %s2269_s2 = int_to_ptr.vmem [resolvable:$false] %s2268_s2 }
  0x3c   : > { %p2266_p4 = pnand %p2264_p13, %p2252_p5  ;;  %s2270_s9 = scalar_lea.vmem %s2269_s2, 2048 }
  0x3d   : > { %p2271_p10 = scmp.lt.s32.totalorder %s239_s22, %s2269_s2  ;;  %p2272_p8 = scmp.lt.s32.totalorder %s2270_s9, %s2263_s11 }
  0x3e   : > { %p2267_p1 = pneg %p2266_p4 }
  0x3f   : > { %p2273_p3 = por %p2272_p8, %p2271_p10 }
  0x41   : > { %p2274_p0 = pnand %p2273_p3, %p2267_p1 }
  0x43   : > { %2277 = shalt.err (!%p2274_p0)
}
  0x44   : > { %s2399_s7 = smov 256   ;;  %s2868_s24 = smov 8  }
  0x45   : > { %s2869_s30 = smov 128   ;;  %250 = sbr.rel (%p2493_p12) target bundleno = 825 (0x339), region = 32 }
  0x46   : > { %2094 = dma.hbm_to_vmem [thread:$0]  (!%p2509_p2), %s237_s13, 1024, %s239_s22, %s226_s10, %s2399_s7, %s2869_s30, %s2868_s24  }
  0x47   : > { %s2560_s5 = sand.u32 (!%p2493_p12), 1, %s2376_s16  }
  0x48   : > { %s2563_s1 = sshll.u32 (!%p2493_p12), %s2560_s5, 6  ;;  %s253_s2 = scalar_lea.sflag (!%p2493_p12), [#allocation3], %s2560_s5 }
  0x49   : > { %s2567_s11 = scalar_lea.vmem (!%p2493_p12), [#allocation2], %s2563_s1 }
  0x4a   : > { %2355 = dma.done.wait (%p2479_p6), %s253_s2, 1024  }
  0x4b   : > { %2357 = vsyncadd (%p2479_p6), %s253_s2, 4294966272  ;;  %p2870_p2 = scmp.ne.s32.totalorder %s2858_s23, 0 }
  0x4d   : > { %2359 = dma.done.wait (%p2870_p2), [#allocation6], 4096  }
  0x4e   : > { %2361 = vsyncadd (%p2870_p2), [#allocation6], 4294963200  ;;  %v2400_v0 = vmov 0.0   ;;  %vm2401_vm0 = vmmov 0   ;;  %vm347_vm1 = vcmask 261120   ;;  %v308_v1 = vld [vmem:[#allocation5 + $0x8] sm:$0xff] }
  0x4f   : > { %1958 = vmatprep.subr.mxu0 %v2400_v0  ;;  %1965 = vmatprep.subr.mxu1 %v2400_v0  ;;  %v310_v2 = vld [vmem:[#allocation5 + $0x18] sm:$0xff]  ;;  %v299_v3 = vld [vmem:[%s2567_s11] sm:$0xff]  ;;  %v300_v4 = vld [vmem:[%s2567_s11 + $0x8] sm:$0xff]  ;;  %vm980_vm2 = vcmask 130048   ;;  %s2689_s23 = scalar_lea.vmem [#allocation9], %s2563_s1  ;;  %s1906_s25 = sshll.u32 %s2384_s18, 7 }
  0x50   : > { %1962 = vmatprep.mubr.msk.f32.mxu0 %vm2401_vm0, %v2400_v0  ;;  %1969 = vmatprep.mubr.msk.f32.mxu1 %vm2401_vm0, %v2400_v0  ;;  %v307_v5 = vld [vmem:[#allocation5] sm:$0xff]  ;;  %v309_v6 = vld [vmem:[#allocation5 + $0x10] sm:$0xff]  ;;  %v339_v7 = vmul.f32 0.17677669, %v299_v3  ;;  %v340_v8 = vmul.f32 0.17677669, %v300_v4  ;;  %s2751_s12 = scalar_lea.hbm %s2850_s4, %s1906_s25 }
  0x51   : > { %1959 = vmatpush3.xpose.msk.msra.mxu0 %vm347_vm1, %v308_v1  ;;  %1966 = vmatpush3.xpose.msk.msra.mxu1 %vm347_vm1, %v310_v2  ;;  %v312_v9 = vld [vmem:[#allocation5 + $0x28] sm:$0xff]  ;;  %v314_v10 = vld [vmem:[#allocation5 + $0x38] sm:$0xff]  ;;  %v301_v11 = vld [vmem:[%s2567_s11 + $0x10] sm:$0xff]  ;;  %s1716_s28 = sshll.u32 %s2689_s23, 4  ;;  %s1683_s13 = scalar_lea.sflag [#allocation10], %s2560_s5  ;;  %s2753_s28 = int_to_ptr.vmem [resolvable:$true] %s1716_s28 }
  0x52   : > { %1960 = vmatprep.subr.mxu0 %v2400_v0  ;;  %1967 = vmatprep.subr.mxu1 %v2400_v0  ;;  %v302_v12 = vld [vmem:[%s2567_s11 + $0x18] sm:$0xff]  ;;  %v311_v13 = vld [vmem:[#allocation5 + $0x20] sm:$0xff]  ;;  %v313_v14 = vld [vmem:[#allocation5 + $0x30] sm:$0xff]  ;;  %v341_v15 = vmul.f32 0.17677669, %v301_v11  ;;  %s2278_s14 = scalar_lea.vmem %s2753_s28, 1024 }
  0x53   : > { %v342_v16 = vmul.f32 0.17677669, %v302_v12  ;;  %v316_v17 = vld [vmem:[#allocation5 + $0x48] sm:$0xff]  ;;  %v318_v18 = vld [vmem:[#allocation5 + $0x58] sm:$0xff]  ;;  %v303_v19 = vld [vmem:[%s2567_s11 + $0x20] sm:$0xff]  ;;  %p2279_p6 = scmp.ne.s32.totalorder %s2753_s28, %s2278_s14  ;;  %p2871_p12 = scmp.ne.s32.totalorder %s2861_s26, 0 }
  0x54   : > { %v304_v20 = vld [vmem:[%s2567_s11 + $0x28] sm:$0xff]  ;;  %v315_v21 = vld [vmem:[#allocation5 + $0x40] sm:$0xff]  ;;  %v317_v22 = vld [vmem:[#allocation5 + $0x50] sm:$0xff]  ;;  %v343_v23 = vmul.f32 0.17677669, %v303_v19  ;;  %s2402_s21 = smov [#allocation9]  }
  0x55   : > { %1961 = vmatpush3.xpose.msk.msra.mxu0 %vm347_vm1, %v307_v5  ;;  %1968 = vmatpush3.xpose.msk.msra.mxu1 %vm347_vm1, %v309_v6  ;;  %v344_v24 = vmul.f32 0.17677669, %v304_v20  ;;  %v320_v25 = vld [vmem:[#allocation5 + $0x68] sm:$0xff]  ;;  %v322_v26 = vld [vmem:[#allocation5 + $0x78] sm:$0xff]  ;;  %v305_v27 = vld [vmem:[%s2567_s11 + $0x30] sm:$0xff]  ;;  %p2280_p9 = pnand %p2279_p6, %p2871_p12  ;;  %s2282_s22 = sshll.u32 %s2402_s21, 4  ;;  %s2283_s22 = int_to_ptr.vmem [resolvable:$false] %s2282_s22 }
  0x56   : > { %1972 = vmatprep.subr.mxu0 %v2400_v0  ;;  %1979 = vmatprep.subr.mxu1 %v2400_v0  ;;  %v306_v28 = vld [vmem:[%s2567_s11 + $0x38] sm:$0xff]  ;;  %v319_v29 = vld [vmem:[#allocation5 + $0x60] sm:$0xff]  ;;  %v321_v30 = vld [vmem:[#allocation5 + $0x70] sm:$0xff]  ;;  %v345_v31 = vmul.f32 0.17677669, %v305_v27  ;;  %s2284_s9 = scalar_lea.vmem %s2283_s22, 2048  ;;  %p2285_p11 = scmp.lt.s32.totalorder %s2753_s28, %s2283_s22 }
  0x57   : > { %v346_v32 = vmul.f32 0.17677669, %v306_v28  ;;  %p2281_p7 = pneg %p2280_p9  ;;  %p2286_p5 = scmp.lt.s32.totalorder %s2284_s9, %s2278_s14 }
  0x58   : > { %1963 = vmatmul.mubr.msk.f32.vlgmr.msra.gmra.mxu0 %vm347_vm1, %v339_v7  ;;  %1970 = vmatmul.mubr.msk.f32.vlgmr.msra.gmra.mxu1 %vm347_vm1, %v340_v8 }
  0x59   : > { %1973 = vmatpush3.xpose.msk.msra.mxu0 %vm347_vm1, %v312_v9  ;;  %1980 = vmatpush3.xpose.msk.msra.mxu1 %vm347_vm1, %v314_v10  ;;  %p2287_p13 = por %p2286_p5, %p2285_p11 }
  0x5a   : > { %1974 = vmatprep.subr.mxu0 %v2400_v0  ;;  %1981 = vmatprep.subr.mxu1 %v2400_v0 }
  0x5b   : > { %1976 = vmatprep.mubr.msk.f32.mxu0 %vm2401_vm0, %v2400_v0  ;;  %1983 = vmatprep.mubr.msk.f32.mxu1 %vm2401_vm0, %v2400_v0  ;;  %p2288_p4 = pnand %p2287_p13, %p2281_p7 }
  0x5d   : > { %1975 = vmatpush3.xpose.msk.msra.mxu0 %vm347_vm1, %v311_v13  ;;  %1982 = vmatpush3.xpose.msk.msra.mxu1 %vm347_vm1, %v313_v14 }
  0x5e   : > { %1986 = vmatprep.subr.mxu0 %v2400_v0  ;;  %1993 = vmatprep.subr.mxu1 %v2400_v0 }
  0x60   : > { %1977 = vmatmul.mubr.msk.f32.vlgmr.msra.gmra.mxu0 %vm347_vm1, %v341_v15  ;;  %1984 = vmatmul.mubr.msk.f32.vlgmr.msra.gmra.mxu1 %vm347_vm1, %v342_v16 }
  0x61   : > { %1987 = vmatpush3.xpose.msk.msra.mxu0 %vm347_vm1, %v316_v17  ;;  %1994 = vmatpush3.xpose.msk.msra.mxu1 %vm347_vm1, %v318_v18 }
  0x62   : > { %1988 = vmatprep.subr.mxu0 %v2400_v0  ;;  %1995 = vmatprep.subr.mxu1 %v2400_v0 }
  0x63   : > { %1990 = vmatprep.mubr.msk.f32.mxu0 %vm2401_vm0, %v2400_v0  ;;  %1997 = vmatprep.mubr.msk.f32.mxu1 %vm2401_vm0, %v2400_v0 }
  0x65   : > { %1989 = vmatpush3.xpose.msk.msra.mxu0 %vm347_vm1, %v315_v21  ;;  %1996 = vmatpush3.xpose.msk.msra.mxu1 %vm347_vm1, %v317_v22 }
  0x66   : > { %2000 = vmatprep.subr.mxu0 %v2400_v0  ;;  %2007 = vmatprep.subr.mxu1 %v2400_v0 }
  0x68   : > { %1991 = vmatmul.mubr.msk.f32.vlgmr.msra.gmra.mxu0 %vm347_vm1, %v343_v23  ;;  %1998 = vmatmul.mubr.msk.f32.vlgmr.msra.gmra.mxu1 %vm347_vm1, %v344_v24 }
  0x69   : > { %2001 = vmatpush3.xpose.msk.msra.mxu0 %vm347_vm1, %v320_v25  ;;  %2008 = vmatpush3.xpose.msk.msra.mxu1 %vm347_vm1, %v322_v26 }
  0x6a   : > { %2002 = vmatprep.subr.mxu0 %v2400_v0  ;;  %2009 = vmatprep.subr.mxu1 %v2400_v0 }
  0x6b   : > { %2004 = vmatprep.mubr.msk.f32.mxu0 %vm2401_vm0, %v2400_v0  ;;  %2011 = vmatprep.mubr.msk.f32.mxu1 %vm2401_vm0, %v2400_v0 }
  0x6d   : > { %2003 = vmatpush3.xpose.msk.msra.mxu0 %vm347_vm1, %v319_v29  ;;  %2010 = vmatpush3.xpose.msk.msra.mxu1 %vm347_vm1, %v321_v30 }
  0x6e   : > { %2014 = vmatprep.subr.mxu0 %v2400_v0  ;;  %2021 = vmatprep.subr.mxu1 %v2400_v0 }
  0x70   : > { %2005 = vmatmul.mubr.msk.f32.vlgmr.msra.gmra.mxu0 %vm347_vm1, %v345_v31  ;;  %2012 = vmatmul.mubr.msk.f32.vlgmr.msra.gmra.mxu1 %vm347_vm1, %v346_v32  ;;  %v324_v31 = vld [vmem:[#allocation7 + $0x8] sm:$0xff]  ;;  %v323_v32 = vld [vmem:[#allocation7] sm:$0xff] }
  0x71   : > { %2018 = vmatprep.mubr.msk.f32.mxu0 %vm2401_vm0, %v2400_v0  ;;  %2025 = vmatprep.mubr.msk.f32.mxu1 %vm2401_vm0, %v2400_v0 }
  0x72   : > { %2015 = vmatpush3.msra.mxu0 %v324_v31 }
  0x73   : > { %2016 = vmatprep.subr.mxu0 %v2400_v0 }
  0x74   : > { %2017 = vmatpush3.msra.mxu0 %v323_v32 }
  0x75   : > { %2028 = vmatprep.subr.mxu0 %v2400_v0 }
 0x118   : > { %v423_v33 = vpop.f32.mrf.mxu0  ;;  %v502_v34 = vpop.f32.mrf.mxu1 }
 0x119   : > { %v981_v35 = vsel %vm980_vm2, %v423_v33, -inf  ;;  %v984_v38 = vsel %vm980_vm2, %v502_v34, -inf }
 0x11a   : > { %v1971_v36 = vpop.f32.mrf.mxu1  ;;  %982 = vmax.xlane.f32.xlu0 %v981_v35  ;;  %v1964_v37 = vpop.f32.mrf.mxu0 }
 0x11b   : > { %v326_v36 = vld [vmem:[#allocation7 + $0x18] sm:$0xff]  ;;  %v325_v37 = vld [vmem:[#allocation7 + $0x10] sm:$0xff] }
 0x11c   : > { %2022 = vmatpush3.msra.mxu1 %v326_v36 }
 0x11d   : > { %2023 = vmatprep.subr.mxu1 %v2400_v0 }
 0x11e   : > { %985 = vmax.xlane.f32.xlu0 %v984_v38  ;;  %2024 = vmatpush3.msra.mxu1 %v325_v37 }
 0x11f   : > { %2035 = vmatprep.subr.mxu1 %v2400_v0 }
 0x120   : > { %v581_v39 = vpop.f32.mrf.mxu0  ;;  %v660_v40 = vpop.f32.mrf.mxu1 }
 0x121   : > { %v987_v41 = vsel %vm980_vm2, %v581_v39, -inf  ;;  %v990_v44 = vsel %vm980_vm2, %v660_v40, -inf }
 0x122   : > { %v1985_v42 = vpop.f32.mrf.mxu1  ;;  %988 = vmax.xlane.f32.xlu1 %v987_v41  ;;  %v1978_v43 = vpop.f32.mrf.mxu0 }
 0x126   : > { %991 = vmax.xlane.f32.xlu1 %v990_v44  ;;  %v328_v44 = vld [vmem:[#allocation7 + $0x28] sm:$0xff] }
 0x128   : > { %v739_v45 = vpop.f32.mrf.mxu0  ;;  %v818_v46 = vpop.f32.mrf.mxu1 }
 0x129   : > { %v996_v47 = vsel %vm980_vm2, %v818_v46, -inf  ;;  %v993_v48 = vsel %vm980_vm2, %v739_v45, -inf }
 0x12a   : > { %v1999_v49 = vpop.f32.mrf.mxu1  ;;  %997 = vmax.xlane.f32.xlu1 %v996_v47  ;;  %994 = vmax.xlane.f32.xlu0 %v993_v48  ;;  %v1992_v50 = vpop.f32.mrf.mxu0  ;;  %v327_v47 = vld [vmem:[#allocation7 + $0x20] sm:$0xff] }
 0x12b   : > { %v330_v50 = vld [vmem:[#allocation7 + $0x38] sm:$0xff] }
 0x130   : > { %v897_v51 = vpop.f32.mrf.mxu0  ;;  %v976_v52 = vpop.f32.mrf.mxu1 }
 0x131   : > { %v1002_v53 = vsel %vm980_vm2, %v976_v52, -inf  ;;  %v999_v54 = vsel %vm980_vm2, %v897_v51, -inf }
 0x132   : > { %v2013_v55 = vpop.f32.mrf.mxu1  ;;  %1003 = vmax.xlane.f32.xlu1 %v1002_v53  ;;  %1000 = vmax.xlane.f32.xlu0 %v999_v54  ;;  %v2006_v56 = vpop.f32.mrf.mxu0  ;;  %v332_v54 = vld [vmem:[#allocation7 + $0x48] sm:$0xff] }
 0x1a3   : > { %v983_v57 = vpop.xlane.xlu0 %982 }
 0x1a4   : > { %v1005_v58 = vsub.f32 %v423_v33, %v983_v57  ;;  %v331_v57 = vld [vmem:[#allocation7 + $0x40] sm:$0xff] }
 0x1a6   : > { %v1013_v59 = vmul.f32 1.442695, %v1005_v58 }
 0x1a7   : > { %v986_v60 = vpop.xlane.xlu0 %985 }
 0x1a8   : > { %2166 = vpow2.f32 %v1013_v59  ;;  %v1006_v61 = vsub.f32 %v502_v34, %v986_v60  ;;  %v334_v60 = vld [vmem:[#allocation7 + $0x58] sm:$0xff] }
 0x1aa   : > { %v1015_v62 = vmul.f32 1.442695, %v1006_v61  ;;  %v333_v61 = vld [vmem:[#allocation7 + $0x50] sm:$0xff] }
 0x1ab   : > { %v989_v63 = vpop.xlane.xlu1 %988 }
 0x1ac   : > { %2168 = vpow2.f32 %v1015_v62  ;;  %v1007_v1 = vsub.f32 %v581_v39, %v989_v63 }
 0x1ae   : > { %v1017_v2 = vmul.f32 1.442695, %v1007_v1 }
 0x1af   : > { %v992_v3 = vpop.xlane.xlu1 %991 }
 0x1b0   : > { %2170 = vpow2.f32 %v1017_v2  ;;  %v1008_v4 = vsub.f32 %v660_v40, %v992_v3  ;;  %v338_v2 = vld [vmem:[#allocation7 + $0x78] sm:$0xff] }
 0x1b2   : > { %v1019_v5 = vmul.f32 1.442695, %v1008_v4  ;;  %v336_v4 = vld [vmem:[#allocation7 + $0x68] sm:$0xff] }
 0x1b3   : > { %v998_v6 = vpop.xlane.xlu1 %997  ;;  %v995_v7 = vpop.xlane.xlu0 %994 }
 0x1b4   : > { %2172 = vpow2.f32 %v1019_v5  ;;  %v1010_v8 = vsub.f32 %v818_v46, %v998_v6  ;;  %v1009_v9 = vsub.f32 %v739_v45, %v995_v7  ;;  %v337_v5 = vld [vmem:[#allocation7 + $0x70] sm:$0xff]  ;;  %v335_v6 = vld [vmem:[#allocation7 + $0x60] sm:$0xff] }
 0x1b5   : > { %v2167_v10 = vpop.eup %2166 }
 0x1b6   : > { %v1023_v11 = vmul.f32 1.442695, %v1010_v8  ;;  %v1021_v12 = vmul.f32 1.442695, %v1009_v9  ;;  %v1029_v13 = vsel %vm980_vm2, %v2167_v10, 0.0 }
 0x1b7   : > { %1030 = vadd.xlane.f32.xlu0 %v1029_v13 }
 0x1b8   : > { %2174 = vpow2.f32 %v1023_v11 }
 0x1b9   : > { %v2656_v14 = vpop.eup %2168  ;;  %2176 = vpow2.f32 %v1021_v12 }
 0x1ba   : > { %v1032_v15 = vsel %vm980_vm2, %v2656_v14, 0.0 }
 0x1bb   : > { %1033 = vadd.xlane.f32.xlu1 %v1032_v15  ;;  %v1004_v16 = vpop.xlane.xlu1 %1003  ;;  %v1001_v17 = vpop.xlane.xlu0 %1000 }
 0x1bc   : > { %v1012_v18 = vsub.f32 %v976_v52, %v1004_v16  ;;  %v1011_v19 = vsub.f32 %v897_v51, %v1001_v17  ;;  %v329_v51 = vld [vmem:[#allocation7 + $0x30] sm:$0xff] }
 0x1bd   : > { %v2660_v20 = vpop.eup %2170 }
 0x1be   : > { %v1027_v21 = vmul.f32 1.442695, %v1012_v18  ;;  %v1025_v22 = vmul.f32 1.442695, %v1011_v19  ;;  %v1035_v23 = vsel %vm980_vm2, %v2660_v20, 0.0 }
 0x1bf   : > { %1036 = vadd.xlane.f32.xlu0 %v1035_v23 }
 0x1c0   : > { %2178 = vpow2.f32 %v1027_v21 }
 0x1c1   : > { %v2664_v24 = vpop.eup %2172  ;;  %2180 = vpow2.f32 %v1025_v22 }
 0x1c2   : > { %v1038_v25 = vsel %vm980_vm2, %v2664_v24, 0.0 }
 0x1c3   : > { %1039 = vadd.xlane.f32.xlu1 %v1038_v25 }
 0x1c5   : > { %v2668_v26 = vpop.eup %2174 }
 0x1c6   : > { %v2670_v27 = vpop.eup %2176  ;;  %v1044_v28 = vsel %vm980_vm2, %v2668_v26, 0.0 }
 0x1c7   : > { %1045 = vadd.xlane.f32.xlu1 %v1044_v28  ;;  %v1041_v29 = vsel %vm980_vm2, %v2670_v27, 0.0 }
 0x1c8   : > { %1042 = vadd.xlane.f32.xlu0 %v1041_v29 }
 0x1cd   : > { %v2676_v30 = vpop.eup %2178 }
 0x1ce   : > { %v2678_v33 = vpop.eup %2180  ;;  %v1050_v34 = vsel %vm980_vm2, %v2676_v30, 0.0 }
 0x1cf   : > { %1051 = vadd.xlane.f32.xlu1 %v1050_v34  ;;  %v1047_v35 = vsel %vm980_vm2, %v2678_v33, 0.0 }
 0x1d0   : > { %1048 = vadd.xlane.f32.xlu0 %v1047_v35 }
 0x240   : > { %v1031_v38 = vpop.xlane.xlu0 %1030 }
 0x241   : > { %2182 = vrcp.f32 %v1031_v38 }
 0x244   : > { %v1034_v39 = vpop.xlane.xlu1 %1033 }
 0x245   : > { %2184 = vrcp.f32 %v1034_v39 }
 0x248   : > { %v1037_v40 = vpop.xlane.xlu0 %1036 }
 0x249   : > { %2186 = vrcp.f32 %v1037_v40 }
 0x24c   : > { %v1040_v41 = vpop.xlane.xlu1 %1039 }
 0x24d   : > { %2188 = vrcp.f32 %v1040_v41 }
 0x24e   : > { %v2183_v42 = vpop.eup %2182 }
 0x24f   : > { %v1069_v43 = vmul.f32 %v2183_v42, %v2167_v10 }
 0x250   : > { %v1046_v45 = vpop.xlane.xlu1 %1045 }
 0x251   : > { %2190 = vrcp.f32 %v1046_v45  ;;  %v1043_v46 = vpop.xlane.xlu0 %1042  ;;  %1077 = vst.msk [vmem:[%s2689_s23] sm:$0xff] %vm980_vm2, %v1069_v43  ;;  %2019 = vmatmul.mubr.msk.f32.vlgmr.msra.gmra.mxu0 %vm980_vm2, %v1069_v43 }
 0x252   : > { %v2185_v48 = vpop.eup %2184  ;;  %2192 = vrcp.f32 %v1043_v46  ;;  %2029 = vmatpush3.msra.mxu0 %v328_v44  ;;  %2032 = vmatprep.mubr.msk.f32.mxu0 %vm2401_vm0, %v2400_v0 }
 0x253   : > { %v1070_v49 = vmul.f32 %v2185_v48, %v2656_v14  ;;  %2030 = vmatprep.subr.mxu0 %v2400_v0 }
 0x254   : > { %2031 = vmatpush3.msra.mxu0 %v327_v47 }
 0x255   : > { %1078 = vst.msk [vmem:[%s2689_s23 + $0x8] sm:$0xff] %vm980_vm2, %v1070_v49  ;;  %2026 = vmatmul.mubr.msk.f32.vlgmr.msra.gmra.mxu1 %vm980_vm2, %v1070_v49  ;;  %2042 = vmatprep.subr.mxu0 %v2400_v0 }
 0x256   : > { %v2187_v52 = vpop.eup %2186  ;;  %2036 = vmatpush3.msra.mxu1 %v330_v50  ;;  %2039 = vmatprep.mubr.msk.f32.mxu1 %vm2401_vm0, %v2400_v0 }
 0x257   : > { %v1071_v53 = vmul.f32 %v2187_v52, %v2660_v20  ;;  %2037 = vmatprep.subr.mxu1 %v2400_v0 }
 0x258   : > { %v1052_v55 = vpop.xlane.xlu1 %1051  ;;  %2038 = vmatpush3.msra.mxu1 %v329_v51 }
 0x259   : > { %2194 = vrcp.f32 %v1052_v55  ;;  %v1049_v56 = vpop.xlane.xlu0 %1048  ;;  %1079 = vst.msk [vmem:[%s2689_s23 + $0x10] sm:$0xff] %vm980_vm2, %v1071_v53  ;;  %2033 = vmatmul.mubr.msk.f32.vlgmr.msra.gmra.mxu0 %vm980_vm2, %v1071_v53  ;;  %2049 = vmatprep.subr.mxu1 %v2400_v0 }
 0x25a   : > { %v2189_v58 = vpop.eup %2188  ;;  %2196 = vrcp.f32 %v1049_v56  ;;  %2043 = vmatpush3.msra.mxu0 %v332_v54  ;;  %2046 = vmatprep.mubr.msk.f32.mxu0 %vm2401_vm0, %v2400_v0 }
 0x25b   : > { %v1072_v59 = vmul.f32 %v2189_v58, %v2664_v24  ;;  %2044 = vmatprep.subr.mxu0 %v2400_v0 }
 0x25c   : > { %2045 = vmatpush3.msra.mxu0 %v331_v57 }
 0x25d   : > { %1080 = vst.msk [vmem:[%s2689_s23 + $0x18] sm:$0xff] %vm980_vm2, %v1072_v59  ;;  %2040 = vmatmul.mubr.msk.f32.vlgmr.msra.gmra.mxu1 %vm980_vm2, %v1072_v59  ;;  %2056 = vmatprep.subr.mxu0 %v2400_v0 }
 0x25e   : > { %v2191_v62 = vpop.eup %2190  ;;  %2050 = vmatpush3.msra.mxu1 %v334_v60  ;;  %2053 = vmatprep.mubr.msk.f32.mxu1 %vm2401_vm0, %v2400_v0 }
 0x25f   : > { %v2193_v63 = vpop.eup %2192  ;;  %2051 = vmatprep.subr.mxu1 %v2400_v0  ;;  %v1074_v1 = vmul.f32 %v2191_v62, %v2668_v26 }
 0x260   : > { %2052 = vmatpush3.msra.mxu1 %v333_v61  ;;  %v1073_v3 = vmul.f32 %v2193_v63, %v2670_v27 }
 0x261   : > { %1082 = vst.msk [vmem:[%s2689_s23 + $0x28] sm:$0xff] %vm980_vm2, %v1074_v1  ;;  %2054 = vmatmul.mubr.msk.f32.vlgmr.msra.gmra.mxu1 %vm980_vm2, %v1074_v1  ;;  %2063 = vmatprep.subr.mxu1 %v2400_v0 }
 0x262   : > { %1081 = vst.msk [vmem:[%s2689_s23 + $0x20] sm:$0xff] %vm980_vm2, %v1073_v3  ;;  %2047 = vmatmul.mubr.msk.f32.vlgmr.msra.gmra.mxu0 %vm980_vm2, %v1073_v3  ;;  %2064 = vmatpush3.msra.mxu1 %v338_v2 }
 0x263   : > { %2057 = vmatpush3.msra.mxu0 %v336_v4  ;;  %2065 = vmatprep.subr.mxu1 %v2400_v0 }
 0x264   : > { %2058 = vmatprep.subr.mxu0 %v2400_v0  ;;  %2066 = vmatpush3.msra.mxu1 %v337_v5 }
 0x265   : > { %2059 = vmatpush3.msra.mxu0 %v335_v6  ;;  %2060 = vmatprep.mubr.msk.f32.mxu0 %vm2401_vm0, %v2400_v0 }
 0x266   : > { %v2195_v7 = vpop.eup %2194  ;;  %2067 = vmatprep.mubr.msk.f32.mxu1 %vm2401_vm0, %v2400_v0 }
 0x267   : > { %v2197_v8 = vpop.eup %2196  ;;  %v1076_v9 = vmul.f32 %v2195_v7, %v2676_v30 }
 0x268   : > { %v1075_v10 = vmul.f32 %v2197_v8, %v2678_v33 }
 0x269   : > { %1084 = vst.msk [vmem:[%s2689_s23 + $0x38] sm:$0xff] %vm980_vm2, %v1076_v9  ;;  %2068 = vmatmul.mubr.msk.f32.vlgmr.msra.gmra.mxu1 %vm980_vm2, %v1076_v9 }
 0x26a   : > { %1083 = vst.msk [vmem:[%s2689_s23 + $0x30] sm:$0xff] %vm980_vm2, %v1075_v10  ;;  %2061 = vmatmul.mubr.msk.f32.vlgmr.msra.gmra.mxu0 %vm980_vm2, %v1075_v10 }
 0x26b   : > { %2291 = shalt.err (!%p2288_p4)
}
 0x26c   : > { %s2292_s7 = scalar_lea.hbm %s2751_s12, 1024  ;;  %s2296_s2 = scalar_lea.hbm %s2850_s4, 2048 }
 0x26d   : > { %p2293_p1 = scmp.ne.s32.totalorder %s2751_s12, %s2292_s7  ;;  %p2297_p3 = scmp.lt.s32.totalorder %s2751_s12, %s2850_s4 }
 0x26e   : > { %p2298_p0 = scmp.lt.s32.totalorder %s2296_s2, %s2292_s7 }
 0x26f   : > { %p2294_p10 = pnand %p2293_p1, %p2871_p12 }
 0x270   : > { %p2299_p2 = por %p2298_p0, %p2297_p3 }
 0x271   : > { %p2295_p8 = pneg %p2294_p10 }
 0x273   : > { %p2300_p6 = pnand %p2299_p2, %p2295_p8 }
 0x275   : > { %2303 = shalt.err (!%p2300_p6)
}
 0x276   : > { %s2403_s6 = smov 128   ;;  %s2404_s10 = smov 256  }
 0x277   : > { %s2405_s14 = smov 8   ;;  %s286_s21 = scalar_lea.vmem [#allocation8], %s2563_s1 }
 0x278   : > { %2081 = dma.vmem_to_hbm [thread:$0]  (%p2871_p12), %s2753_s28, 1024, %s2751_s12, %s1683_s13, %s2403_s6, %s2404_s10, %s2405_s14  }
 0x279   : > { %s1698_s1 = sshll.u32 %s286_s21, 4  ;;  %s2795_s13 = scalar_lea.hbm %s2849_s3, %s1906_s25  ;;  %s2788_s1 = int_to_ptr.vmem [resolvable:$true] %s1698_s1 }
 0x27a   : > { %s1678_s22 = scalar_lea.sflag [#allocation4], %s2560_s5  ;;  %s2304_s9 = scalar_lea.vmem %s2788_s1, 1024 }
 0x27b   : > { %p2305_p9 = scmp.ne.s32.totalorder %s2788_s1, %s2304_s9  ;;  %s2406_s18 = smov [#allocation8]  }
 0x27c   : > { %s2308_s7 = sshll.u32 %s2406_s18, 4  ;;  %s2309_s7 = int_to_ptr.vmem [resolvable:$false] %s2308_s7 }
 0x27d   : > { %p2306_p7 = pnand %p2305_p9, %p2871_p12  ;;  %s2310_s24 = scalar_lea.vmem %s2309_s7, 2048 }
 0x27e   : > { %p2311_p5 = scmp.lt.s32.totalorder %s2788_s1, %s2309_s7  ;;  %p2312_p13 = scmp.lt.s32.totalorder %s2310_s24, %s2304_s9 }
 0x27f   : > { %p2307_p11 = pneg %p2306_p7 }
 0x280   : > { %p2313_p4 = por %p2312_p13, %p2311_p5 }
 0x282   : > { %p2314_p1 = pnand %p2313_p4, %p2307_p11 }
 0x311   : > { %v1154_v0 = vpop.f32.mrf.mxu0 }
 0x312   : > { %1669 = vst.msk [vmem:[%s286_s21] sm:$0xff] %vm347_vm1, %v1154_v0 }
 0x313   : > { %v2020_v11 = vpop.f32.mrf.mxu0 }
 0x315   : > { %v1227_v12 = vpop.f32.mrf.mxu1 }
 0x316   : > { %1670 = vst.msk [vmem:[%s286_s21 + $0x8] sm:$0xff] %vm347_vm1, %v1227_v12 }
 0x317   : > { %v2027_v13 = vpop.f32.mrf.mxu1 }
 0x319   : > { %v1300_v14 = vpop.f32.mrf.mxu0 }
 0x31a   : > { %1671 = vst.msk [vmem:[%s286_s21 + $0x10] sm:$0xff] %vm347_vm1, %v1300_v14 }
 0x31b   : > { %v2034_v15 = vpop.f32.mrf.mxu0 }
 0x31d   : > { %v1373_v16 = vpop.f32.mrf.mxu1 }
 0x31e   : > { %1672 = vst.msk [vmem:[%s286_s21 + $0x18] sm:$0xff] %vm347_vm1, %v1373_v16 }
 0x31f   : > { %v2041_v17 = vpop.f32.mrf.mxu1 }
 0x321   : > { %v1519_v18 = vpop.f32.mrf.mxu1 }
 0x322   : > { %v1446_v19 = vpop.f32.mrf.mxu0  ;;  %1674 = vst.msk [vmem:[%s286_s21 + $0x28] sm:$0xff] %vm347_vm1, %v1519_v18 }
 0x323   : > { %1673 = vst.msk [vmem:[%s286_s21 + $0x20] sm:$0xff] %vm347_vm1, %v1446_v19  ;;  %v2055_v20 = vpop.f32.mrf.mxu1 }
 0x324   : > { %v2048_v21 = vpop.f32.mrf.mxu0 }
 0x329   : > { %v1665_v22 = vpop.f32.mrf.mxu1 }
 0x32a   : > { %v1592_v23 = vpop.f32.mrf.mxu0  ;;  %1676 = vst.msk [vmem:[%s286_s21 + $0x38] sm:$0xff] %vm347_vm1, %v1665_v22 }
 0x32b   : > { %1675 = vst.msk [vmem:[%s286_s21 + $0x30] sm:$0xff] %vm347_vm1, %v1592_v23  ;;  %v2069_v24 = vpop.f32.mrf.mxu1 }
 0x32c   : > { %v2062_v25 = vpop.f32.mrf.mxu0 }
 0x32d   : > { %2317 = shalt.err (!%p2314_p1)
}
 0x32e   : > { %s2318_s25 = scalar_lea.hbm %s2795_s13, 1024  ;;  %s2322_s2 = scalar_lea.hbm %s2849_s3, 2048 }
 0x32f   : > { %p2319_p10 = scmp.ne.s32.totalorder %s2795_s13, %s2318_s25  ;;  %p2323_p0 = scmp.lt.s32.totalorder %s2795_s13, %s2849_s3 }
 0x330   : > { %p2324_p2 = scmp.lt.s32.totalorder %s2322_s2, %s2318_s25 }
 0x331   : > { %p2320_p8 = pnand %p2319_p10, %p2871_p12 }
 0x332   : > { %p2325_p6 = por %p2324_p2, %p2323_p0 }
 0x333   : > { %p2321_p3 = pneg %p2320_p8 }
 0x335   : > { %p2326_p9 = pnand %p2325_p6, %p2321_p3 }
 0x337   : > { %2329 = shalt.err (!%p2326_p9)
}
 0x338   : > { %2080 = dma.vmem_to_hbm [thread:$0]  (%p2871_p12), %s2788_s1, 1024, %s2795_s13, %s1678_s22, %s2403_s6, %s2404_s10, %s2405_s14  }
 0x339 PF: > { %s1731_s21 = sand.u32 1, %s2372_s15   ;;  %p2872_p7 = scmp.ne.s32.totalorder %s2862_s27, 0 }
 0x33a   : > { %p2873_p11 = scmp.ge.s32.totalorder %s2392_s20, 2  ;;  %s1732_s28 = scalar_lea.sflag [#allocation4], %s1731_s21 }
 0x33c   : > { %p2096_p5 = pnand %p2873_p11, %p2872_p7 }
 0x33e   : > { %p2097_p13 = pneg %p2096_p5 }
 0x340   : > { %2363 = dma.done.wait (%p2097_p13), %s1732_s28, 1024  }
 0x341   : > { %2365 = vsyncadd (%p2097_p13), %s1732_s28, 4294966272  ;;  %s1741_s12 = scalar_lea.sflag [#allocation10], %s1731_s21 }
 0x342   : > { %2367 = dma.done.wait (%p2097_p13), %s1741_s12, 1024  }
 0x343   : > { %2369 = vsyncadd (%p2097_p13), %s1741_s12, 4294966272  ;;  %s25_s20 = sadd.s32 1, %s2392_s20   ;;  %s2874_s15 = smov %s2376_s16 }
 0x344   : > { %p22_p4 = scmp.ge.s32.totalorder %s25_s20, 4   ;;  %s2875_s16 = smov %s2380_s17 }
 0x345   : > { %s2876_s17 = smov %s2549_s8  ;;  %s2877_s18 = smov %s2388_s19 }
 0x346   : > { %s2878_s19 = smov %s2880_s29  ;;  %24 = sbr.rel (!%p22_p4) target bundleno = 12 (0xc), region = 104 }
 0x34b   :  { %1746 = vsyncpa [#allocation3], 1 }
 0x34c   :  { %1748 = vsyncpa [#allocation3 + $0x1], 1 }
 0x34d   :  { %1749 = vsyncpa [#allocation6], 1 }
 0x34e   :  { %1750 = vsyncpa [#allocation4], 1 }
 0x34f   :  { %1752 = vsyncpa [#allocation4 + $0x1], 1 }
 0x350   :  { %1753 = vsyncpa [#allocation10], 1 }
 0x351   :  { %1755 = vsyncpa [#allocation10 + $0x1], 1 }

</bundles_post_ra>
